<compile_context>
chip_gen: v6e
topology: v6e:2x2x1
jax: 0.10.0
libtpu: 0.0.40
codegen_flags: <defaults>
</compile_context>

<pallas_src>
import jax
import jax.numpy as jnp
from jax.experimental import pallas as pl
from jax.experimental.pallas import tpu as pltpu


CHANNEL_CNN = 128                     # conv out channels per branch
KERNEL = 4                            # Conv1d kernel size
N_BRANCHES = 5                        # five per-channel conv branches
CONV_T = 5                            # conv output length implied by incoming_size = 5*128*5
FC1_OUT = 256
CK = N_BRANCHES * KERNEL              # 20  (im2col patch width, all branches stacked)
CONV_COLS = N_BRANCHES * CHANNEL_CNN  # 640 (conv output width per time-step)


# ----------------------------------------------------------------------------
# Fused kernel: conv (block-diag matmul) + bias + ReLU + fc1 + ReLU + fc3
#   patches: (T, Bt, 20) f32      w_block: (20, 640) f32    bias_block: (1, 640) f32
#   w1p    : (T, 640, 256) bf16   b1: (1, 256) f32
#   w3row  : (1, 256) f32         b3: (1, 1) f32
#   out    : (Bt, 1) f32
# ----------------------------------------------------------------------------
def critic_kernel(patches_ref, wblk_ref, bblk_ref, w1p_ref, b1_ref,
                  w3_ref, b3_ref, o_ref):
    bt = patches_ref.shape[1]
    wblk = wblk_ref[...]                          # (20, 640) f32, tiny, VMEM-resident
    bblk = bblk_ref[...]                          # (1, 640)  f32

    # fc1 accumulator initialized with the fc1 bias (hoisted out of the loop).
    h = jnp.broadcast_to(b1_ref[...], (bt, FC1_OUT)).astype(jnp.float32)

    for t in range(CONV_T):                       # static, unrolled (T = 5)
        p_t = patches_ref[t]                      # (Bt, 20) f32
        conv = jnp.dot(p_t, wblk, preferred_element_type=jnp.float32)
        act = jnp.maximum(conv + bblk, 0.0)       # (Bt, 640) f32 elementwise
        # fc1 contribution of this time-step (w1 rows pre-permuted to match).
        h = h + jnp.dot(act.astype(jnp.bfloat16), w1p_ref[t],
                        preferred_element_type=jnp.float32)

    h = jnp.maximum(h, 0.0)                       # (Bt, 256) f32
    # fc3: VPU multiply + lane (XLU) reduction instead of a 1-column MXU matmul.
    out = jnp.sum(h * w3_ref[...], axis=-1, keepdims=True) + b3_ref[...]
    o_ref[...] = out


# ----------------------------------------------------------------------------
# One-time parameter preparation (all layout plumbing lives here, not in forward)
# ----------------------------------------------------------------------------
def prepare_params(params):
    C, K, CNN, T = N_BRANCHES, KERNEL, CHANNEL_CNN, CONV_T

    # Block-diagonal conv weight: w_block[c*K + k, c*128 + co] = conv_w[c][co, k]
    w_block = jnp.zeros((C * K, C * CNN), jnp.float32)
    for c in range(C):
        w_block = w_block.at[c * K:(c + 1) * K,
                             c * CNN:(c + 1) * CNN].set(params["conv_ws"][c].T)
    bias_block = jnp.concatenate(params["conv_bs"], axis=0).reshape(1, C * CNN)

    # Fold the torch flatten/cat order (row index = c*640 + co*5 + t) into a
    # permutation of w1's input axis: w1p[t, c*128 + co, :] = w1[c*640 + co*5 + t, :]
    w1p = params["w1"].reshape(C, CNN, T, FC1_OUT)
    w1p = jnp.transpose(w1p, (2, 0, 1, 3)).reshape(T, C * CNN, FC1_OUT)
    w1p = w1p.astype(jnp.bfloat16)                # halve the dominant weight stream

    return dict(
        w_block=w_block,
        bias_block=bias_block,
        w1p=w1p,
        b1=params["b1"].reshape(1, -1).astype(jnp.float32),
        w3row=params["w3"].reshape(1, -1).astype(jnp.float32),   # (1, 256)
        b3=params["b3"].reshape(1, 1).astype(jnp.float32),
    )


# ----------------------------------------------------------------------------
# Forward pass: tiny im2col glue + single fused pallas_call
# ----------------------------------------------------------------------------
def critic_forward(x, prep, *, block_b=256):
    """x: (B, 5, L) float32 with L - KERNEL + 1 == 5.  Returns (B, 1)."""
    B, C, L = x.shape
    assert C == N_BRANCHES
    T = L - KERNEL + 1
    assert T == CONV_T, "incoming_size=3200 implies conv output length 5 (L=8)"

    # Batch tile: multiple of 8 sublanes, capped at block_b.
    if B >= block_b:
        bt = block_b
    else:
        bt = max(8, ((B + 7) // 8) * 8)
    b_pad = ((B + bt - 1) // bt) * bt
    if b_pad != B:
        x = jnp.pad(x, ((0, b_pad - B), (0, 0), (0, 0)))

    # im2col glue (tiny): patches[t, b, c*K + k] = x[b, c, t + k]
    idx = jnp.arange(T)[:, None] + jnp.arange(KERNEL)[None, :]       # (T, K)
    p = x[:, :, idx]                                                 # (Bp, C, T, K)
    patches = jnp.transpose(p, (2, 0, 1, 3)).reshape(T, b_pad, CK)   # (T, Bp, 20)

    grid = (b_pad // bt,)
    flops = 2 * b_pad * (CONV_T * CK * CONV_COLS
                         + CONV_T * CONV_COLS * FC1_OUT
                         + FC1_OUT)
    bytes_accessed = (patches.size * 4 + prep["w_block"].size * 4
                      + prep["w1p"].size * 2 + CONV_COLS * 4
                      + FC1_OUT * 4 * 2 + b_pad * 4)

    out = pl.pallas_call(
        critic_kernel,
        out_shape=jax.ShapeDtypeStruct((b_pad, 1), jnp.float32),
        grid=grid,
        in_specs=[
            pl.BlockSpec((T, bt, CK), lambda i: (0, i, 0)),            # batch-tiled
            pl.BlockSpec((CK, CONV_COLS), lambda i: (0, 0)),           # VMEM-resident
            pl.BlockSpec((1, CONV_COLS), lambda i: (0, 0)),
            pl.BlockSpec((T, CONV_COLS, FC1_OUT), lambda i: (0, 0, 0)),
            pl.BlockSpec((1, FC1_OUT), lambda i: (0, 0)),
            pl.BlockSpec((1, FC1_OUT), lambda i: (0, 0)),
            pl.BlockSpec((1, 1), lambda i: (0, 0)),
        ],
        out_specs=pl.BlockSpec((bt, 1), lambda i: (i, 0)),
        compiler_params=pltpu.CompilerParams(
            dimension_semantics=("parallel",)),
        cost_estimate=pl.CostEstimate(flops=flops, transcendentals=0,
                                      bytes_accessed=bytes_accessed),
    )(patches, prep["w_block"], prep["bias_block"], prep["w1p"],
      prep["b1"], prep["w3row"], prep["b3"])

    return out[:B]


# ----------------------------------------------------------------------------
# Pure-JAX reference (mirrors the PyTorch forward semantics exactly, f32)
# ----------------------------------------------------------------------------
def critic_reference(x, params):
    B, C, L = x.shape
    T = L - KERNEL + 1
    feats = []
    for c in range(C):
        xc = x[:, c, :]                                      # (B, L)
        wc = params["conv_ws"][c]                            # (128, K)
        bc = params["conv_bs"][c]                            # (128,)
        outs = []
        for t in range(T):
            window = xc[:, t:t + KERNEL]                     # (B, K)
            outs.append(window @ wc.T)                       # (B, 128)
        out = jnp.stack(outs, axis=-1) + bc[None, :, None]   # (B, 128, T)
        out = jnp.maximum(out, 0.0)
        feats.append(out.reshape(B, -1))                     # (B, 128*T)
    xcat = jnp.concatenate(feats, axis=1)                    # (B, 3200)
    h = jnp.maximum(xcat @ params["w1"] + params["b1"], 0.0)
    return h @ params["w3"] + params["b3"]


# ----------------------------------------------------------------------------
def make_params(key):
    keys = jax.random.split(key, 2 * N_BRANCHES + 4)
    conv_ws, conv_bs = [], []
    for c in range(N_BRANCHES):
        conv_ws.append(0.1 * jax.random.normal(keys[2 * c],
                                               (CHANNEL_CNN, KERNEL), jnp.float32))
        conv_bs.append(0.1 * jax.random.normal(keys[2 * c + 1],
                                               (CHANNEL_CNN,), jnp.float32))
    incoming = N_BRANCHES * CHANNEL_CNN * CONV_T  # 3200
    w1 = 0.02 * jax.random.normal(keys[-4], (incoming, FC1_OUT), jnp.float32)
    b1 = 0.02 * jax.random.normal(keys[-3], (FC1_OUT,), jnp.float32)
    w3 = 0.02 * jax.random.normal(keys[-2], (FC1_OUT, 1), jnp.float32)
    b3 = 0.02 * jax.random.normal(keys[-1], (1,), jnp.float32)
    return dict(conv_ws=conv_ws, conv_bs=conv_bs, w1=w1, b1=b1, w3=w3, b3=b3)


if __name__ == "__main__":
    key = jax.random.PRNGKey(0)
    pkey, xkey = jax.random.split(key)
    params = make_params(pkey)
    prep = prepare_params(params)          # one-time weight layout prep

    B, C, L = 2, 5, 8   # L=8 -> conv output length 5, matching incoming_size=3200
    x = jax.random.normal(xkey, (B, C, L), jnp.float32)

    fwd = jax.jit(critic_forward)
    out = jax.block_until_ready(fwd(x, prep))

    ref = critic_reference(x, params)
    assert out.shape == (B, 1), out.shape
    # fc1 runs with bf16 weights / activations (f32 accumulation): allow small slack.
    assert jnp.allclose(out, ref, atol=5e-3, rtol=5e-2), (out, ref)
    print("KERNEL_OK")
</pallas_src>

<mosaic_0001>
module attributes {stable_mosaic.version = 11 : i64} {
  func.func @critic_kernel(%arg0: i32, %arg1: memref<5x8x20xf32, #tpu.memory_space<vmem>>, %arg2: memref<20x640xf32, #tpu.memory_space<vmem>>, %arg3: memref<1x640xf32, #tpu.memory_space<vmem>>, %arg4: memref<5x640x256xbf16, #tpu.memory_space<vmem>>, %arg5: memref<1x256xf32, #tpu.memory_space<vmem>>, %arg6: memref<1x256xf32, #tpu.memory_space<vmem>>, %arg7: memref<1x1xf32, #tpu.memory_space<vmem>>, %arg8: memref<8x1xf32, #tpu.memory_space<vmem>>) attributes {dimension_semantics = [#tpu.dimension_semantics<parallel>], iteration_bounds = array<i64: 1>, scalar_prefetch = 0 : i64, scratch_operands = 0 : i64, tpu.core_type = #tpu.core_type<tc>, window_params = [{transform_indices = @transform_0, window_bounds = array<i64: 5, 8, 20>}, {pipeline_mode = #tpu.pipeline_mode<synchronous>, transform_indices = @transform_1, window_bounds = array<i64: 20, 640>}, {pipeline_mode = #tpu.pipeline_mode<synchronous>, transform_indices = @transform_2, window_bounds = array<i64: 1, 640>}, {pipeline_mode = #tpu.pipeline_mode<synchronous>, transform_indices = @transform_3, window_bounds = array<i64: 5, 640, 256>}, {pipeline_mode = #tpu.pipeline_mode<synchronous>, transform_indices = @transform_4, window_bounds = array<i64: 1, 256>}, {pipeline_mode = #tpu.pipeline_mode<synchronous>, transform_indices = @transform_5, window_bounds = array<i64: 1, 256>}, {pipeline_mode = #tpu.pipeline_mode<synchronous>, transform_indices = @transform_6, window_bounds = array<i64: 1, 1>}, {transform_indices = @transform_7, window_bounds = array<i64: 8, 1>}]} {
    %c0 = arith.constant 0 : index
    %c0_0 = arith.constant 0 : index
    %0 = vector.load %arg2[%c0, %c0_0] : memref<20x640xf32, #tpu.memory_space<vmem>>, vector<20x640xf32>
    %c0_1 = arith.constant 0 : index
    %c0_2 = arith.constant 0 : index
    %1 = vector.load %arg3[%c0_1, %c0_2] : memref<1x640xf32, #tpu.memory_space<vmem>>, vector<1x640xf32>
    %c0_3 = arith.constant 0 : index
    %c0_4 = arith.constant 0 : index
    %2 = vector.load %arg5[%c0_3, %c0_4] : memref<1x256xf32, #tpu.memory_space<vmem>>, vector<1x256xf32>
    %3 = vector.shape_cast %2 : vector<1x256xf32> to vector<1x256xf32>
    %4 = vector.broadcast %3 : vector<1x256xf32> to vector<8x256xf32>
    %c0_5 = arith.constant 0 : index
    %c0_6 = arith.constant 0 : index
    %c0_7 = arith.constant 0 : index
    %5 = vector.load %arg1[%c0_5, %c0_6, %c0_7] : memref<5x8x20xf32, #tpu.memory_space<vmem>>, vector<1x8x20xf32>
    %6 = vector.shape_cast %5 : vector<1x8x20xf32> to vector<8x20xf32>
    %cst = arith.constant dense<0.000000e+00> : vector<8x640xf32>
    %7 = tpu.matmul %6, %0, %cst {dimension_numbers = #tpu.dot_dimension_numbers<[1], [0], [0], [1], [0, 0, 1, 1], [], []>} : vector<8x20xf32>, vector<20x640xf32>, vector<8x640xf32> -> vector<8x640xf32>
    %8 = vector.broadcast %1 : vector<1x640xf32> to vector<8x640xf32>
    %9 = arith.addf %7, %8 : vector<8x640xf32>
    %cst_8 = arith.constant 0.000000e+00 : f32
    %10 = vector.broadcast %cst_8 : f32 to vector<8x640xf32>
    %11 = arith.maximumf %9, %10 : vector<8x640xf32>
    %12 = arith.truncf %11 : vector<8x640xf32> to vector<8x640xbf16>
    %c0_9 = arith.constant 0 : index
    %c0_10 = arith.constant 0 : index
    %c0_11 = arith.constant 0 : index
    %13 = vector.load %arg4[%c0_9, %c0_10, %c0_11] : memref<5x640x256xbf16, #tpu.memory_space<vmem>>, vector<1x640x256xbf16>
    %14 = vector.shape_cast %13 : vector<1x640x256xbf16> to vector<640x256xbf16>
    %cst_12 = arith.constant dense<0.000000e+00> : vector<8x256xf32>
    %15 = tpu.matmul %12, %14, %cst_12 {dimension_numbers = #tpu.dot_dimension_numbers<[1], [0], [0], [1], [0, 0, 1, 1], [], []>} : vector<8x640xbf16>, vector<640x256xbf16>, vector<8x256xf32> -> vector<8x256xf32>
    %16 = arith.addf %4, %15 : vector<8x256xf32>
    %c1 = arith.constant 1 : index
    %c0_13 = arith.constant 0 : index
    %c0_14 = arith.constant 0 : index
    %17 = vector.load %arg1[%c1, %c0_13, %c0_14] : memref<5x8x20xf32, #tpu.memory_space<vmem>>, vector<1x8x20xf32>
    %18 = vector.shape_cast %17 : vector<1x8x20xf32> to vector<8x20xf32>
    %cst_15 = arith.constant dense<0.000000e+00> : vector<8x640xf32>
    %19 = tpu.matmul %18, %0, %cst_15 {dimension_numbers = #tpu.dot_dimension_numbers<[1], [0], [0], [1], [0, 0, 1, 1], [], []>} : vector<8x20xf32>, vector<20x640xf32>, vector<8x640xf32> -> vector<8x640xf32>
    %20 = vector.broadcast %1 : vector<1x640xf32> to vector<8x640xf32>
    %21 = arith.addf %19, %20 : vector<8x640xf32>
    %cst_16 = arith.constant 0.000000e+00 : f32
    %22 = vector.broadcast %cst_16 : f32 to vector<8x640xf32>
    %23 = arith.maximumf %21, %22 : vector<8x640xf32>
    %24 = arith.truncf %23 : vector<8x640xf32> to vector<8x640xbf16>
    %c1_17 = arith.constant 1 : index
    %c0_18 = arith.constant 0 : index
    %c0_19 = arith.constant 0 : index
    %25 = vector.load %arg4[%c1_17, %c0_18, %c0_19] : memref<5x640x256xbf16, #tpu.memory_space<vmem>>, vector<1x640x256xbf16>
    %26 = vector.shape_cast %25 : vector<1x640x256xbf16> to vector<640x256xbf16>
    %cst_20 = arith.constant dense<0.000000e+00> : vector<8x256xf32>
    %27 = tpu.matmul %24, %26, %cst_20 {dimension_numbers = #tpu.dot_dimension_numbers<[1], [0], [0], [1], [0, 0, 1, 1], [], []>} : vector<8x640xbf16>, vector<640x256xbf16>, vector<8x256xf32> -> vector<8x256xf32>
    %28 = arith.addf %16, %27 : vector<8x256xf32>
    %c2 = arith.constant 2 : index
    %c0_21 = arith.constant 0 : index
    %c0_22 = arith.constant 0 : index
    %29 = vector.load %arg1[%c2, %c0_21, %c0_22] : memref<5x8x20xf32, #tpu.memory_space<vmem>>, vector<1x8x20xf32>
    %30 = vector.shape_cast %29 : vector<1x8x20xf32> to vector<8x20xf32>
    %cst_23 = arith.constant dense<0.000000e+00> : vector<8x640xf32>
    %31 = tpu.matmul %30, %0, %cst_23 {dimension_numbers = #tpu.dot_dimension_numbers<[1], [0], [0], [1], [0, 0, 1, 1], [], []>} : vector<8x20xf32>, vector<20x640xf32>, vector<8x640xf32> -> vector<8x640xf32>
    %32 = vector.broadcast %1 : vector<1x640xf32> to vector<8x640xf32>
    %33 = arith.addf %31, %32 : vector<8x640xf32>
    %cst_24 = arith.constant 0.000000e+00 : f32
    %34 = vector.broadcast %cst_24 : f32 to vector<8x640xf32>
    %35 = arith.maximumf %33, %34 : vector<8x640xf32>
    %36 = arith.truncf %35 : vector<8x640xf32> to vector<8x640xbf16>
    %c2_25 = arith.constant 2 : index
    %c0_26 = arith.constant 0 : index
    %c0_27 = arith.constant 0 : index
    %37 = vector.load %arg4[%c2_25, %c0_26, %c0_27] : memref<5x640x256xbf16, #tpu.memory_space<vmem>>, vector<1x640x256xbf16>
    %38 = vector.shape_cast %37 : vector<1x640x256xbf16> to vector<640x256xbf16>
    %cst_28 = arith.constant dense<0.000000e+00> : vector<8x256xf32>
    %39 = tpu.matmul %36, %38, %cst_28 {dimension_numbers = #tpu.dot_dimension_numbers<[1], [0], [0], [1], [0, 0, 1, 1], [], []>} : vector<8x640xbf16>, vector<640x256xbf16>, vector<8x256xf32> -> vector<8x256xf32>
    %40 = arith.addf %28, %39 : vector<8x256xf32>
    %c3 = arith.constant 3 : index
    %c0_29 = arith.constant 0 : index
    %c0_30 = arith.constant 0 : index
    %41 = vector.load %arg1[%c3, %c0_29, %c0_30] : memref<5x8x20xf32, #tpu.memory_space<vmem>>, vector<1x8x20xf32>
    %42 = vector.shape_cast %41 : vector<1x8x20xf32> to vector<8x20xf32>
    %cst_31 = arith.constant dense<0.000000e+00> : vector<8x640xf32>
    %43 = tpu.matmul %42, %0, %cst_31 {dimension_numbers = #tpu.dot_dimension_numbers<[1], [0], [0], [1], [0, 0, 1, 1], [], []>} : vector<8x20xf32>, vector<20x640xf32>, vector<8x640xf32> -> vector<8x640xf32>
    %44 = vector.broadcast %1 : vector<1x640xf32> to vector<8x640xf32>
    %45 = arith.addf %43, %44 : vector<8x640xf32>
    %cst_32 = arith.constant 0.000000e+00 : f32
    %46 = vector.broadcast %cst_32 : f32 to vector<8x640xf32>
    %47 = arith.maximumf %45, %46 : vector<8x640xf32>
    %48 = arith.truncf %47 : vector<8x640xf32> to vector<8x640xbf16>
    %c3_33 = arith.constant 3 : index
    %c0_34 = arith.constant 0 : index
    %c0_35 = arith.constant 0 : index
    %49 = vector.load %arg4[%c3_33, %c0_34, %c0_35] : memref<5x640x256xbf16, #tpu.memory_space<vmem>>, vector<1x640x256xbf16>
    %50 = vector.shape_cast %49 : vector<1x640x256xbf16> to vector<640x256xbf16>
    %cst_36 = arith.constant dense<0.000000e+00> : vector<8x256xf32>
    %51 = tpu.matmul %48, %50, %cst_36 {dimension_numbers = #tpu.dot_dimension_numbers<[1], [0], [0], [1], [0, 0, 1, 1], [], []>} : vector<8x640xbf16>, vector<640x256xbf16>, vector<8x256xf32> -> vector<8x256xf32>
    %52 = arith.addf %40, %51 : vector<8x256xf32>
    %c4 = arith.constant 4 : index
    %c0_37 = arith.constant 0 : index
    %c0_38 = arith.constant 0 : index
    %53 = vector.load %arg1[%c4, %c0_37, %c0_38] : memref<5x8x20xf32, #tpu.memory_space<vmem>>, vector<1x8x20xf32>
    %54 = vector.shape_cast %53 : vector<1x8x20xf32> to vector<8x20xf32>
    %cst_39 = arith.constant dense<0.000000e+00> : vector<8x640xf32>
    %55 = tpu.matmul %54, %0, %cst_39 {dimension_numbers = #tpu.dot_dimension_numbers<[1], [0], [0], [1], [0, 0, 1, 1], [], []>} : vector<8x20xf32>, vector<20x640xf32>, vector<8x640xf32> -> vector<8x640xf32>
    %56 = vector.broadcast %1 : vector<1x640xf32> to vector<8x640xf32>
    %57 = arith.addf %55, %56 : vector<8x640xf32>
    %cst_40 = arith.constant 0.000000e+00 : f32
    %58 = vector.broadcast %cst_40 : f32 to vector<8x640xf32>
    %59 = arith.maximumf %57, %58 : vector<8x640xf32>
    %60 = arith.truncf %59 : vector<8x640xf32> to vector<8x640xbf16>
    %c4_41 = arith.constant 4 : index
    %c0_42 = arith.constant 0 : index
    %c0_43 = arith.constant 0 : index
    %61 = vector.load %arg4[%c4_41, %c0_42, %c0_43] : memref<5x640x256xbf16, #tpu.memory_space<vmem>>, vector<1x640x256xbf16>
    %62 = vector.shape_cast %61 : vector<1x640x256xbf16> to vector<640x256xbf16>
    %cst_44 = arith.constant dense<0.000000e+00> : vector<8x256xf32>
    %63 = tpu.matmul %60, %62, %cst_44 {dimension_numbers = #tpu.dot_dimension_numbers<[1], [0], [0], [1], [0, 0, 1, 1], [], []>} : vector<8x640xbf16>, vector<640x256xbf16>, vector<8x256xf32> -> vector<8x256xf32>
    %64 = arith.addf %52, %63 : vector<8x256xf32>
    %cst_45 = arith.constant 0.000000e+00 : f32
    %65 = vector.broadcast %cst_45 : f32 to vector<8x256xf32>
    %66 = arith.maximumf %64, %65 : vector<8x256xf32>
    %c0_46 = arith.constant 0 : index
    %c0_47 = arith.constant 0 : index
    %67 = vector.load %arg6[%c0_46, %c0_47] : memref<1x256xf32, #tpu.memory_space<vmem>>, vector<1x256xf32>
    %68 = vector.broadcast %67 : vector<1x256xf32> to vector<8x256xf32>
    %69 = arith.mulf %66, %68 : vector<8x256xf32>
    %cst_48 = arith.constant dense<0.000000e+00> : vector<8xf32>
    %70 = vector.multi_reduction <add>, %69, %cst_48 [1] : vector<8x256xf32> to vector<8xf32>
    %71 = vector.shape_cast %70 : vector<8xf32> to vector<8x1xf32>
    %c0_49 = arith.constant 0 : index
    %c0_50 = arith.constant 0 : index
    %72 = vector.load %arg7[%c0_49, %c0_50] : memref<1x1xf32, #tpu.memory_space<vmem>>, vector<1x1xf32>
    %73 = vector.broadcast %72 : vector<1x1xf32> to vector<8x1xf32>
    %74 = arith.addf %71, %73 : vector<8x1xf32>
    %c0_51 = arith.constant 0 : index
    %c0_52 = arith.constant 0 : index
    %75 = vector.load %arg8[%c0_51, %c0_52] : memref<8x1xf32, #tpu.memory_space<vmem>>, vector<8x1xf32>
    tpu.vector_store %arg8[%c0_51, %c0_52], %74 {strides = array<i32>} : memref<8x1xf32, #tpu.memory_space<vmem>>, vector<8x1xf32>,
    return
  }
  func.func @transform_0(%arg0: i32) -> (i32, i32, i32) {
    %c0_i32 = arith.constant 0 : i32
    %c0_i32_0 = arith.constant 0 : i32
    %c0_i32_1 = arith.constant 0 : i32
    return %c0_i32, %arg0, %c0_i32_0 : i32, i32, i32
  }
  func.func @transform_1(%arg0: i32) -> (i32, i32) {
    %c0_i32 = arith.constant 0 : i32
    %c0_i32_0 = arith.constant 0 : i32
    %c0_i32_1 = arith.constant 0 : i32
    return %c0_i32, %c0_i32_0 : i32, i32
  }
  func.func @transform_2(%arg0: i32) -> (i32, i32) {
    %c0_i32 = arith.constant 0 : i32
    %c0_i32_0 = arith.constant 0 : i32
    %c0_i32_1 = arith.constant 0 : i32
    return %c0_i32, %c0_i32_0 : i32, i32
  }
  func.func @transform_3(%arg0: i32) -> (i32, i32, i32) {
    %c0_i32 = arith.constant 0 : i32
    %c0_i32_0 = arith.constant 0 : i32
    %c0_i32_1 = arith.constant 0 : i32
    %c0_i32_2 = arith.constant 0 : i32
    return %c0_i32, %c0_i32_0, %c0_i32_1 : i32, i32, i32
  }
  func.func @transform_4(%arg0: i32) -> (i32, i32) {
    %c0_i32 = arith.constant 0 : i32
    %c0_i32_0 = arith.constant 0 : i32
    %c0_i32_1 = arith.constant 0 : i32
    return %c0_i32, %c0_i32_0 : i32, i32
  }
  func.func @transform_5(%arg0: i32) -> (i32, i32) {
    %c0_i32 = arith.constant 0 : i32
    %c0_i32_0 = arith.constant 0 : i32
    %c0_i32_1 = arith.constant 0 : i32
    return %c0_i32, %c0_i32_0 : i32, i32
  }
  func.func @transform_6(%arg0: i32) -> (i32, i32) {
    %c0_i32 = arith.constant 0 : i32
    %c0_i32_0 = arith.constant 0 : i32
    %c0_i32_1 = arith.constant 0 : i32
    return %c0_i32, %c0_i32_0 : i32, i32
  }
  func.func @transform_7(%arg0: i32) -> (i32, i32) {
    %c0_i32 = arith.constant 0 : i32
    %c0_i32_0 = arith.constant 0 : i32
    return %arg0, %c0_i32 : i32, i32
  }
}

</mosaic_0001>

<bundles_post_ra>
// kernel: critic_forward.1
= control target key start
LH: loop header
LB: loop body
LE: loop exit
PB: predicated region body
PF: predicated region fallthrough
CT: control target
= control target key end

     0   :  { %s5951_s0 = inlined_call_operand.vmem [shape: f32[5,8,20], index: 0, kind: input, shape index: {}]   ;;  %s5952_s1 = inlined_call_operand.hbm [shape: f32[20,640], index: 1, kind: input, shape index: {}]   ;;  %s5953_s2 = inlined_call_operand.hbm [shape: f32[1,640], index: 2, kind: input, shape index: {}]   ;;  %s5954_s3 = inlined_call_operand.hbm [shape: bf16[5,640,256], index: 3, kind: input, shape index: {}]   ;;  %s5955_s4 = inlined_call_operand.hbm [shape: f32[1,256], index: 4, kind: input, shape index: {}]   ;;  %s5956_s5 = inlined_call_operand.hbm [shape: f32[1,256], index: 5, kind: input, shape index: {}]   ;;  %s5957_s6 = inlined_call_operand.<no memory space> [shape: f32[1,1], index: 6, kind: input, shape index: {}]   ;;  %s5958_s7 = inlined_call_operand.vmem [shape: f32[8,1], index: 7, kind: output, shape index: {}]  }
   0x1   :  { %v12_v0 = vstv %s5957_s6 }
   0x2   :  { %13 = vst [vmem:[#allocation2] sm:$0x1] %v12_v0 }
   0x3   :  { %14 = vsyncpa [#allocation4], 0 }
   0x4   :  { %15 = vsyncpa [#allocation6], 0 }
   0x5   :  { %16 = vsyncpa [#allocation9], 0  ;;  %s5618_s26 = smov [#allocation5]   ;;  %s5619_s28 = smov [#allocation8]  }
   0x6   :  { %s37_s27 = sshll.u32 %s5618_s26, 4  ;;  %s59_s29 = sshll.u32 %s5619_s28, 4  ;;  %s38_s27 = int_to_ptr.vmem [resolvable:$true] %s37_s27  ;;  %s60_s29 = int_to_ptr.vmem [resolvable:$true] %s59_s29 }
   0x7   :  { %s5520_s30 = scalar_lea.vmem %s38_s27, 80  ;;  %s5524_s8 = scalar_lea.vmem %s38_s27, 96 }
   0x8   :  { %p5521_p0 = scmp.ne.s32.totalorder %s38_s27, %s5520_s30  ;;  %p5525_p1 = scmp.lt.s32.totalorder %s38_s27, %s38_s27 }
   0x9   :  { %p5526_p2 = scmp.lt.s32.totalorder %s5524_s8, %s5520_s30 }
   0xb   :  { %p5527_p3 = por %p5526_p2, %p5525_p1 }
   0xd   :  { %p5528_p4 = pnand %p5527_p3, %p5521_p0 }
   0xf   :  { %5531 = shalt.err (!%p5528_p4)
}
  0x10   :  { %40 = dma.hbm_to_vmem [thread:$0]  %s5953_s2, 80, %s38_s27, [#allocation6]  }
  0x11   :  { %s5540_s10 = scalar_lea.vmem %s60_s29, 32  ;;  %p5545_p6 = scmp.lt.s32.totalorder %s60_s29, %s60_s29 }
  0x12   :  { %p5541_p5 = scmp.ne.s32.totalorder %s60_s29, %s5540_s10  ;;  %p5546_p7 = scmp.lt.s32.totalorder %s5540_s10, %s5540_s10 }
  0x14   :  { %p5547_p8 = por %p5546_p7, %p5545_p6 }
  0x16   :  { %p5548_p9 = pnand %p5547_p8, %p5541_p5 }
  0x18   :  { %5551 = shalt.err (!%p5548_p9)
}
  0x19   :  { %62 = dma.hbm_to_vmem [thread:$0]  %s5955_s4, 32, %s60_s29, [#allocation9]  }
  0x1a   :  { %s5620_s13 = smov [#allocation3]  }
  0x1b   :  { %s24_s14 = sshll.u32 %s5620_s13, 4  ;;  %s25_s14 = int_to_ptr.vmem [resolvable:$true] %s24_s14 }
  0x1c   :  { %s5560_s15 = scalar_lea.vmem %s25_s14, 1920  ;;  %p5565_p11 = scmp.lt.s32.totalorder %s25_s14, %s25_s14 }
  0x1d   :  { %p5561_p10 = scmp.ne.s32.totalorder %s25_s14, %s5560_s15  ;;  %p5566_p12 = scmp.lt.s32.totalorder %s5560_s15, %s5560_s15 }
  0x1f   :  { %p5567_p13 = por %p5566_p12, %p5565_p11 }
  0x21   :  { %p5568_p0 = pnand %p5567_p13, %p5561_p10 }
  0x23   :  { %5571 = shalt.err (!%p5568_p0)
}
  0x24   :  { %s5621_s2 = smov 640   ;;  %s5622_s16 = smov 40  }
  0x25   :  { %30 = dma.hbm_to_vmem [thread:$0]  %s5952_s1, 1920, %s25_s14, [#allocation4], %s5621_s2, %s5621_s2, %s5622_s16  }
  0x26   :  { %s5623_s19 = smov [#allocation7]  }
  0x27   :  { %s46_s20 = sshll.u32 %s5623_s19, 4  ;;  %s47_s20 = int_to_ptr.vmem [resolvable:$true] %s46_s20 }
  0x28   :  { %s5580_s4 = scalar_lea.vmem %s47_s20, 51200  ;;  %p5585_p2 = scmp.lt.s32.totalorder %s47_s20, %s47_s20 }
  0x29   :  { %p5581_p1 = scmp.ne.s32.totalorder %s47_s20, %s5580_s4  ;;  %p5586_p3 = scmp.lt.s32.totalorder %s5580_s4, %s5580_s4 }
  0x2b   :  { %p5587_p4 = por %p5586_p3, %p5585_p2 }
  0x2d   :  { %p5588_p5 = pnand %p5587_p4, %p5581_p1 }
  0x2f   :  { %5591 = shalt.err (!%p5588_p5)
}
  0x30   :  { %s5624_s21 = smov 128   ;;  %s5625_s22 = smov 8  }
  0x31   :  { %52 = dma.hbm_to_vmem [thread:$0]  %s5954_s3, 51200, %s47_s20, [#allocation6], %s5624_s21, %s5624_s21, %s5625_s22  }
  0x32   :  { %s5626_s25 = smov [#allocation10]  }
  0x33   :  { %s69_s26 = sshll.u32 %s5626_s25, 4  ;;  %s70_s26 = int_to_ptr.vmem [resolvable:$true] %s69_s26 }
  0x34   :  { %s5600_s1 = scalar_lea.vmem %s70_s26, 32  ;;  %p5605_p7 = scmp.lt.s32.totalorder %s70_s26, %s70_s26 }
  0x35   :  { %p5601_p6 = scmp.ne.s32.totalorder %s70_s26, %s5600_s1  ;;  %p5606_p8 = scmp.lt.s32.totalorder %s5600_s1, %s5600_s1 }
  0x37   :  { %p5607_p9 = por %p5606_p8, %p5605_p7 }
  0x39   :  { %p5608_p10 = pnand %p5607_p9, %p5601_p6 }
  0x3b   :  { %5611 = shalt.err (!%p5608_p10)
}
  0x3c   :  { %72 = dma.hbm_to_vmem [thread:$0]  %s5956_s5, 32, %s70_s26, [#allocation9]  }
  0x3d   :  { %5612 = dma.done.wait [#allocation4], 1920  }
  0x3e   :  { %5613 = vsyncadd [#allocation4], 4294965376 }
  0x3f   :  { %5614 = dma.done.wait [#allocation6], 51280  }
  0x40   :  { %5615 = vsyncadd [#allocation6], 4294916016 }
  0x41   :  { %5616 = dma.done.wait [#allocation9], 64  }
  0x42   :  { %5617 = vsyncadd [#allocation9], 4294967232  ;;  %v5627_v1 = vmov 0.0   ;;  %vm150_vm0 = vcmask 1043456   ;;  %v5689_v2 = vld [vmem:[#allocation3 + $0x58] sm:$0xf] }
  0x43   :  { %230 = vmatprep.mubr.f32.mxu0 %v5627_v1  ;;  %v101_v3 = vld [vmem:[#allocation3 + $0x50] sm:$0xf]  ;;  %4361 = vmatprep.subr.msk.mxu0 %vm150_vm0, %v5689_v2  ;;  %v96_v5 = vld [vmem:[#allocation3 + $0x28] sm:$0xff]  ;;  %v91_v7 = vld [vmem:[#allocation3] sm:$0xff]  ;;  %vm146_vm1 = vcmask 162816   ;;  %vm5628_vm2 = vmmov 0  }
  0x44   :  { %v97_v4 = vld [vmem:[#allocation3 + $0x30] sm:$0xff]  ;;  %4362 = vmatpush1.msk.msra.mxu0 %vm150_vm0, %v101_v3  ;;  %v92_v6 = vld [vmem:[#allocation3 + $0x8] sm:$0xff]  ;;  %v119_v8 = vld [vmem:[%s5951_s0] sm:$0xff]  ;;  %vm4352_vm3 = vcmask 7168  }
  0x45   :  { %194 = vmatprep.subr.mxu0 %v97_v4  ;;  %v104_v9 = vld [vmem:[#allocation3 + $0x68] sm:$0xf]  ;;  %v103_v10 = vld [vmem:[#allocation3 + $0x60] sm:$0xf]  ;;  %v4883_v12 = vld [vmem:[#allocation7 + $0x74] ss:$8 sps:$4 sm:$0xff]  }
  0x46   :  { %195 = vmatpush1.msra.mxu0 %v96_v5  ;;  %v99_v11 = vld [vmem:[#allocation3 + $0x40] sm:$0xff]  ;;  %v4885_v13 = vld [vmem:[#allocation7 + $0x70] ss:$8 sps:$4 sm:$0xff]   ;;  %868 = vmatprep.subr.bf16.mxu1 %v4883_v12  ;;  %v4892_v20 = vld [vmem:[#allocation7 + $0x54] ss:$8 sps:$4 sm:$0xff]  }
  0x47   :  { %196 = vmatprep.subr.mxu0 %v92_v6  ;;  %v98_v14 = vld [vmem:[#allocation3 + $0x38] sm:$0xff]  ;;  %v4886_v15 = vld [vmem:[#allocation7 + $0x64] ss:$8 sps:$4 sm:$0xff]   ;;  %v93_v17 = vld [vmem:[#allocation3 + $0x10] sm:$0xff]  ;;  %869 = vmatpush1.bf16.msra.mxu1 %v4885_v13 }
  0x48   :  { %197 = vmatpush1.msra.mxu0 %v91_v7  ;;  %v94_v16 = vld [vmem:[#allocation3 + $0x18] sm:$0xff]  ;;  %v105_v18 = vld [vmem:[#allocation3 + $0x70] sm:$0xf]  ;;  %870 = vmatprep.subr.bf16.mxu1 %v4886_v15  ;;  %v100_v21 = vld [vmem:[#allocation3 + $0x48] sm:$0xff] }
  0x49   :  { %4363 = vmatmul.mubr.msk.f32.vlgmr.msra.gmra.mxu0 %vm146_vm1, %v119_v8  ;;  %4364 = vmatprep.subr.msk.mxu0 %vm150_vm0, %v104_v9  ;;  %v4888_v19 = vld [vmem:[#allocation7 + $0x60] ss:$8 sps:$4 sm:$0xff]   ;;  %v4889_v23 = vld [vmem:[#allocation7 + $0x170] ss:$8 sps:$4 sm:$0xff]   ;;  %v4891_v24 = vld [vmem:[#allocation7 + $0x174] ss:$8 sps:$4 sm:$0xff]  }
  0x4a   :  { %4365 = vmatpush1.msk.msra.mxu0 %vm150_vm0, %v103_v10  ;;  %301 = vmatprep.mubr.f32.mxu0 %v5627_v1  ;;  %v95_v22 = vld [vmem:[#allocation3 + $0x20] sm:$0xff]  ;;  %v4894_v25 = vld [vmem:[#allocation7 + $0x50] ss:$8 sps:$4 sm:$0xff]   ;;  %v4903_v30 = vld [vmem:[#allocation7 + $0x154] ss:$8 sps:$4 sm:$0xff]  }
  0x4b   :  { %265 = vmatprep.subr.mxu0 %v99_v11  ;;  %871 = vmatpush1.bf16.msra.mxu1 %v4888_v19  ;;  %v4897_v26 = vld [vmem:[#allocation7 + $0x164] ss:$8 sps:$4 sm:$0xff]   ;;  %v4895_v28 = vld [vmem:[#allocation7 + $0x160] ss:$8 sps:$4 sm:$0xff]   ;;  %v4904_v31 = vld [vmem:[#allocation7 + $0x34] ss:$8 sps:$4 sm:$0xff]  }
  0x4c   :  { %266 = vmatpush1.msra.mxu0 %v98_v14  ;;  %872 = vmatprep.subr.bf16.mxu1 %v4892_v20  ;;  %v4898_v27 = vld [vmem:[#allocation7 + $0x44] ss:$8 sps:$4 sm:$0xff]   ;;  %v4900_v29 = vld [vmem:[#allocation7 + $0x40] ss:$8 sps:$4 sm:$0xff]   ;;  %v4901_v32 = vld [vmem:[#allocation7 + $0x150] ss:$8 sps:$4 sm:$0xff]  }
  0x4d   :  { %267 = vmatprep.subr.mxu0 %v94_v16  ;;  %v4906_v33 = vld [vmem:[#allocation7 + $0x30] ss:$8 sps:$4 sm:$0xff]   ;;  %v4909_v34 = vld [vmem:[#allocation7 + $0x144] ss:$8 sps:$4 sm:$0xff]   ;;  %v4907_v36 = vld [vmem:[#allocation7 + $0x140] ss:$8 sps:$4 sm:$0xff]  }
  0x4e   :  { %268 = vmatpush1.msra.mxu0 %v93_v17  ;;  %v4910_v35 = vld [vmem:[#allocation7 + $0x24] ss:$8 sps:$4 sm:$0xff]   ;;  %v4912_v37 = vld [vmem:[#allocation7 + $0x20] ss:$8 sps:$4 sm:$0xff]   ;;  %v4915_v38 = vld [vmem:[#allocation7 + $0x134] ss:$8 sps:$4 sm:$0xff]  }
  0x4f   :  { %4366 = vmatmul.mubr.msk.f32.vlgmr.msra.gmra.mxu0 %vm146_vm1, %v119_v8  ;;  %4826 = vmatprep.subr.mxu0 %v5627_v1  ;;  %v4916_v39 = vld [vmem:[#allocation7 + $0x14] ss:$8 sps:$4 sm:$0xff]   ;;  %v4913_v40 = vld [vmem:[#allocation7 + $0x130] ss:$8 sps:$4 sm:$0xff]   ;;  %v4921_v42 = vld [vmem:[#allocation7 + $0x124] ss:$8 sps:$4 sm:$0xff]  }
  0x50   :  { %4827 = vmatpush3.msk.msra.mxu0 %vm150_vm0, %v105_v18  ;;  %4832 = vmatprep.mubr.msk.f32.mxu0 %vm5628_vm2, %v5627_v1  ;;  %v4918_v41 = vld [vmem:[#allocation7 + $0x10] ss:$8 sps:$4 sm:$0xff]   ;;  %v4922_v43 = vld [vmem:[#allocation7 + $0x4] ss:$8 sps:$4 sm:$0xff]   ;;  %v4919_v44 = vld [vmem:[#allocation7 + $0x120] ss:$8 sps:$4 sm:$0xff]  }
  0x51   :  { %4828 = vmatprep.subr.mxu0 %v5627_v1  ;;  %873 = vmatpush1.bf16.msra.mxu1 %v4894_v25  ;;  %v4924_v45 = vld [vmem:[#allocation7] ss:$8 sps:$4 sm:$0xff]   ;;  %v4927_v46 = vld [vmem:[#allocation7 + $0x114] ss:$8 sps:$4 sm:$0xff]   ;;  %v4925_v48 = vld [vmem:[#allocation7 + $0x110] ss:$8 sps:$4 sm:$0xff]  }
  0x52   :  { %4829 = vmatpush3.msra.mxu0 %v100_v21  ;;  %874 = vmatprep.subr.bf16.mxu1 %v4898_v27  ;;  %v4928_v47 = vld [vmem:[#allocation7 + $0xf4] ss:$8 sps:$4 sm:$0xff]   ;;  %v4930_v49 = vld [vmem:[#allocation7 + $0xf0] ss:$8 sps:$4 sm:$0xff]   ;;  %v4933_v50 = vld [vmem:[#allocation7 + $0x104] ss:$8 sps:$4 sm:$0xff]   ;;  %v109_v21 = vlaneseq }
  0x53   :  { %4830 = vmatprep.subr.mxu0 %v5627_v1  ;;  %v4934_v51 = vld [vmem:[#allocation7 + $0xe4] ss:$8 sps:$4 sm:$0xff]   ;;  %v4931_v52 = vld [vmem:[#allocation7 + $0x100] ss:$8 sps:$4 sm:$0xff]   ;;  %v4939_v54 = vld [vmem:[#allocation7 + $0x1f4] ss:$8 sps:$4 sm:$0xff]  }
  0x54   :  { %4831 = vmatpush3.msra.mxu0 %v95_v22  ;;  %v4936_v53 = vld [vmem:[#allocation7 + $0xe0] ss:$8 sps:$4 sm:$0xff]   ;;  %v4940_v55 = vld [vmem:[#allocation7 + $0xd4] ss:$8 sps:$4 sm:$0xff]   ;;  %v4937_v56 = vld [vmem:[#allocation7 + $0x1f0] ss:$8 sps:$4 sm:$0xff]  }
  0x55   :  { %4833 = vmatmul.mubr.msk.f32.vlgmr.msra.gmra.mxu0 %vm146_vm1, %v119_v8  ;;  %909 = vmatprep.subr.bf16.mxu0 %v4891_v24  ;;  %v4942_v57 = vld [vmem:[#allocation7 + $0xd0] ss:$8 sps:$4 sm:$0xff]   ;;  %v4945_v58 = vld [vmem:[#allocation7 + $0x1e4] ss:$8 sps:$4 sm:$0xff]   ;;  %v4943_v60 = vld [vmem:[#allocation7 + $0x1e0] ss:$8 sps:$4 sm:$0xff]  }
  0x56   :  { %910 = vmatpush1.bf16.msra.mxu0 %v4889_v23  ;;  %875 = vmatpush1.bf16.msra.mxu1 %v4900_v29  ;;  %v4946_v59 = vld [vmem:[#allocation7 + $0xc4] ss:$8 sps:$4 sm:$0xff]   ;;  %v4948_v61 = vld [vmem:[#allocation7 + $0xc0] ss:$8 sps:$4 sm:$0xff]   ;;  %v4951_v62 = vld [vmem:[#allocation7 + $0x1d4] ss:$8 sps:$4 sm:$0xff]  }
  0x57   :  { %911 = vmatprep.subr.bf16.mxu0 %v4897_v26  ;;  %876 = vmatprep.subr.bf16.mxu1 %v4904_v31  ;;  %v4952_v63 = vld [vmem:[#allocation7 + $0xb4] ss:$8 sps:$4 sm:$0xff]   ;;  %v4949_v0 = vld [vmem:[#allocation7 + $0x1d0] ss:$8 sps:$4 sm:$0xff]   ;;  %v4957_v4 = vld [vmem:[#allocation7 + $0x1c4] ss:$8 sps:$4 sm:$0xff]  }
  0x58   :  { %v4954_v3 = vld [vmem:[#allocation7 + $0xb0] ss:$8 sps:$4 sm:$0xff]   ;;  %v4958_v5 = vld [vmem:[#allocation7 + $0xa4] ss:$8 sps:$4 sm:$0xff]   ;;  %v4955_v6 = vld [vmem:[#allocation7 + $0x1c0] ss:$8 sps:$4 sm:$0xff]  }
  0x59   :  { %v4960_v7 = vld [vmem:[#allocation7 + $0xa0] ss:$8 sps:$4 sm:$0xff]   ;;  %v4963_v8 = vld [vmem:[#allocation7 + $0x1b4] ss:$8 sps:$4 sm:$0xff]   ;;  %v4961_v9 = vld [vmem:[#allocation7 + $0x1b0] ss:$8 sps:$4 sm:$0xff]  }
  0x5a   :  { %912 = vmatpush1.bf16.msra.mxu0 %v4895_v28  ;;  %877 = vmatpush1.bf16.msra.mxu1 %v4906_v33  ;;  %v4964_v10 = vld [vmem:[#allocation7 + $0x94] ss:$8 sps:$4 sm:$0xff]   ;;  %v4966_v11 = vld [vmem:[#allocation7 + $0x90] ss:$8 sps:$4 sm:$0xff]   ;;  %v4969_v12 = vld [vmem:[#allocation7 + $0x1a4] ss:$8 sps:$4 sm:$0xff]  }
  0x5b   :  { %913 = vmatprep.subr.bf16.mxu0 %v4903_v30  ;;  %878 = vmatprep.subr.bf16.mxu1 %v4910_v35  ;;  %v4967_v13 = vld [vmem:[#allocation7 + $0x1a0] ss:$8 sps:$4 sm:$0xff]   ;;  %v4970_v14 = vld [vmem:[#allocation7 + $0x84] ss:$8 sps:$4 sm:$0xff]   ;;  %v4975_v16 = vld [vmem:[#allocation7 + $0x194] ss:$8 sps:$4 sm:$0xff]  }
  0x5c   :  { %v4972_v15 = vld [vmem:[#allocation7 + $0x80] ss:$8 sps:$4 sm:$0xff]   ;;  %v4973_v17 = vld [vmem:[#allocation7 + $0x190] ss:$8 sps:$4 sm:$0xff]   ;;  %v4978_v18 = vld [vmem:[#allocation7 + $0x274] ss:$8 sps:$4 sm:$0xff]  }
  0x5d   :  { %v4981_v19 = vld [vmem:[#allocation7 + $0x184] ss:$8 sps:$4 sm:$0xff]   ;;  %v4979_v20 = vld [vmem:[#allocation7 + $0x180] ss:$8 sps:$4 sm:$0xff]   ;;  %v5711_v22 = vshrl.u32 %v109_v21, 7 }
  0x5e   :  { %914 = vmatpush1.bf16.msra.mxu0 %v4901_v32  ;;  %879 = vmatpush1.bf16.msra.mxu1 %v4912_v37  ;;  %v5716_v24 = vld [vmem:[#allocation5] sm:$0x1f] }
  0x5f   :  { %915 = vmatprep.subr.bf16.mxu0 %v4909_v34  ;;  %880 = vmatprep.subr.bf16.mxu1 %v4916_v39  ;;  %v5714_v23 = vsub.s32 0, %v5711_v22  ;;  %v5719_v25 = vsub.s32 1, %v5711_v22  ;;  %v135_v30 = vsub.s32 3, %v5711_v22  ;;  %v5003_v21 = vld [vmem:[#allocation7 + $0x2f0] ss:$8 sps:$4 sm:$0xff]  }
  0x61   :  { %v5723_v26 = vrot.slane %v5716_v24, %v5714_v23  ;;  %v5727_v27 = vrot.slane %v5716_v24, %v5719_v25  ;;  %v5737_v35 = vrot.slane %v5716_v24, %v135_v30  ;;  %v5006_v30 = vld [vmem:[#allocation7 + $0x2e0] ss:$8 sps:$4 sm:$0xff]  }
  0x62   :  { %916 = vmatpush1.bf16.msra.mxu0 %v4907_v36  ;;  %881 = vmatpush1.bf16.msra.mxu1 %v4918_v41 }
  0x63   :  { %917 = vmatprep.subr.bf16.mxu0 %v4915_v38  ;;  %882 = vmatprep.subr.bf16.mxu1 %v4922_v43  ;;  %v4984_v43 = vld [vmem:[#allocation7 + $0x264] ss:$8 sps:$4 sm:$0xff]  }
  0x66   :  { %918 = vmatpush1.bf16.msra.mxu0 %v4913_v40  ;;  %883 = vmatpush1.bf16.msra.mxu1 %v4924_v45  ;;  %v4976_v40 = vld [vmem:[#allocation7 + $0x270] ss:$8 sps:$4 sm:$0xff]  }
  0x67   :  { %919 = vmatprep.subr.bf16.mxu0 %v4921_v42  ;;  %884 = vmatprep.subr.bf16.mxu1 %v4928_v47  ;;  %v4982_v47 = vld [vmem:[#allocation7 + $0x260] ss:$8 sps:$4 sm:$0xff]  }
  0x6a   :  { %920 = vmatpush1.bf16.msra.mxu0 %v4919_v44  ;;  %885 = vmatpush2.bf16.msra.mxu1 %v4930_v49  ;;  %v4987_v49 = vld [vmem:[#allocation7 + $0x254] ss:$8 sps:$4 sm:$0xff]  }
  0x6b   :  { %921 = vmatprep.subr.bf16.mxu0 %v4927_v46  ;;  %886 = vmatprep.subr.bf16.mxu1 %v4934_v51 }
  0x6e   :  { %922 = vmatpush1.bf16.msra.mxu0 %v4925_v48  ;;  %887 = vmatpush2.bf16.msra.mxu1 %v4936_v53  ;;  %v5629_v48 = vmov 0  }
  0x6f   :  { %923 = vmatprep.subr.bf16.mxu0 %v4933_v50  ;;  %888 = vmatprep.subr.bf16.mxu1 %v4940_v55  ;;  %v4990_v55 = vld [vmem:[#allocation7 + $0x244] ss:$8 sps:$4 sm:$0xff]  }
  0x72   :  { %924 = vmatpush1.bf16.msra.mxu0 %v4931_v52  ;;  %889 = vmatpush2.bf16.msra.mxu1 %v4942_v57  ;;  %v5747_v57 = vld [vmem:[#allocation3 + $0x30] sm:$0xff] }
  0x73   :  { %925 = vmatprep.subr.bf16.mxu0 %v4939_v54  ;;  %890 = vmatprep.subr.bf16.mxu1 %v4946_v59  ;;  %v4985_v54 = vld [vmem:[#allocation7 + $0x250] ss:$8 sps:$4 sm:$0xff]   ;;  %v4988_v59 = vld [vmem:[#allocation7 + $0x240] ss:$8 sps:$4 sm:$0xff]  }
  0x76   :  { %926 = vmatpush2.bf16.msra.mxu0 %v4937_v56  ;;  %891 = vmatpush2.bf16.msra.mxu1 %v4948_v61  ;;  %v5742_v56 = vld [vmem:[#allocation3 + $0x50] sm:$0xf] }
  0x77   :  { %927 = vmatprep.subr.bf16.mxu0 %v4945_v58  ;;  %892 = vmatprep.subr.bf16.mxu1 %v4952_v63  ;;  %v5750_v58 = vld [vmem:[#allocation3 + $0x28] sm:$0xff]  ;;  %v4993_v61 = vld [vmem:[#allocation7 + $0x234] ss:$8 sps:$4 sm:$0xff]  }
  0x78   :  { %v4449_v63 = vld [vmem:[%s5951_s0 + $0x8] sm:$0xff] }
  0x7a   :  { %928 = vmatpush2.bf16.msra.mxu0 %v4943_v60  ;;  %893 = vmatpush2.bf16.msra.mxu1 %v4954_v3  ;;  %v5753_v60 = vld [vmem:[#allocation3 + $0x8] sm:$0xff]  ;;  %v139_v3 = vsub.s32 4, %v5711_v22 }
  0x7b   :  { %929 = vmatprep.subr.bf16.mxu0 %v4951_v62  ;;  %894 = vmatprep.subr.bf16.mxu1 %v4958_v5  ;;  %v5756_v62 = vld [vmem:[#allocation3] sm:$0xff] }
  0x7c   :  { %v4996_v5 = vld [vmem:[#allocation7 + $0x224] ss:$8 sps:$4 sm:$0xff]  }
  0x7e   :  { %930 = vmatpush2.bf16.msra.mxu0 %v4949_v0  ;;  %895 = vmatpush2.bf16.msra.mxu1 %v4960_v7  ;;  %v5762_v0 = vld [vmem:[#allocation3 + $0x68] sm:$0xf]  ;;  %v5773_v7 = vld [vmem:[#allocation3 + $0x40] sm:$0xff] }
  0x7f   :  { %931 = vmatprep.subr.bf16.mxu0 %v4957_v4  ;;  %896 = vmatprep.subr.bf16.mxu1 %v4964_v10  ;;  %v4991_v4 = vld [vmem:[#allocation7 + $0x230] ss:$8 sps:$4 sm:$0xff]   ;;  %v4994_v10 = vld [vmem:[#allocation7 + $0x220] ss:$8 sps:$4 sm:$0xff]  }
  0x82   :  { %932 = vmatpush2.bf16.msra.mxu0 %v4955_v6  ;;  %897 = vmatpush2.bf16.msra.mxu1 %v4966_v11  ;;  %v5768_v6 = vld [vmem:[#allocation3 + $0x60] sm:$0xf]  ;;  %v5782_v11 = vld [vmem:[#allocation3 + $0x18] sm:$0xff] }
  0x83   :  { %933 = vmatprep.subr.bf16.mxu0 %v4963_v8  ;;  %898 = vmatprep.subr.bf16.mxu1 %v4970_v14  ;;  %v5777_v8 = vrot.slane %v5716_v24, %v139_v3  ;;  %v5050_v3 = vld [vmem:[#allocation7 + $0x374] ss:$8 sps:$4 sm:$0xff]  }
  0x86   :  { %934 = vmatpush2.bf16.msra.mxu0 %v4961_v9  ;;  %899 = vmatpush2.bf16.msra.mxu1 %v4972_v15  ;;  %v5779_v9 = vld [vmem:[#allocation3 + $0x38] sm:$0xff] }
  0x87   :  { %935 = vmatprep.subr.bf16.mxu0 %v4969_v12  ;;  %950 = vmatprep.subr.bf16.mxu1 %v4978_v18  ;;  %v4999_v12 = vld [vmem:[#allocation7 + $0x214] ss:$8 sps:$4 sm:$0xff]   ;;  %v4997_v15 = vld [vmem:[#allocation7 + $0x210] ss:$8 sps:$4 sm:$0xff]  }
  0x88   :  { %v5796_v18 = vld [vmem:[#allocation3 + $0x48] sm:$0xff] }
  0x8a   :  { %936 = vmatpush2.bf16.msra.mxu0 %v4967_v13  ;;  %v5785_v13 = vld [vmem:[#allocation3 + $0x10] sm:$0xff] }
  0x8b   :  { %937 = vmatprep.subr.bf16.mxu0 %v4975_v16  ;;  %v5791_v16 = vld [vmem:[#allocation3 + $0x70] sm:$0xf] }
  0x8e   :  { %938 = vmatpush2.bf16.msra.mxu0 %v4973_v17  ;;  %v5002_v17 = vld [vmem:[#allocation7 + $0x204] ss:$8 sps:$4 sm:$0xff]  }
  0x8f   :  { %939 = vmatprep.subr.bf16.mxu0 %v4981_v19  ;;  %v5005_v19 = vld [vmem:[#allocation7 + $0x2f4] ss:$8 sps:$4 sm:$0xff]  }
  0x92   :  { %940 = vmatpush2.bf16.msra.mxu0 %v4979_v20 }
  0x93   :  { %4450 = vmatprep.subr.msk.mxu0 %vm150_vm0, %v5689_v2  ;;  %v131_v2 = vsub.s32 2, %v5711_v22  ;;  %v5000_v22 = vld [vmem:[#allocation7 + $0x200] ss:$8 sps:$4 sm:$0xff]  }
  0x95   :  { %v5734_v33 = vrot.slane %v5716_v24, %v131_v2  ;;  %v5802_v24 = vld [vmem:[#allocation3 + $0x20] sm:$0xff] }
  0x96   :  { %v5008_v2 = vld [vmem:[#allocation7 + $0x2e4] ss:$8 sps:$4 sm:$0xff]  }
 0x109   :  { %v232_v28 = vpop.f32.mrf.mxu0 }
 0x10a   :  { %v233_v29 = vadd.f32 %v232_v28, %v5723_v26  ;;  %v5011_v28 = vld [vmem:[#allocation7 + $0x3f4] ss:$8 sps:$4 sm:$0xff]  }
 0x10b   :  { %v234_v31 = vpop.f32.mrf.mxu0 }
 0x10c   :  { %v235_v32 = vadd.f32 %v234_v31, %v5727_v27  ;;  %v378_v34 = vmax.f32 %v233_v29, 0.0  ;;  %v5009_v31 = vld [vmem:[#allocation7 + $0x3f0] ss:$8 sps:$4 sm:$0xff]  }
 0x10e   :  { %v379_v36 = vmax.f32 %v235_v32, 0.0  ;;  %v383_v41 = vpack.c.bf16 %v378_v34, %v378_v34  ;;  %v5014_v32 = vld [vmem:[#allocation7 + $0x2d4] ss:$8 sps:$4 sm:$0xff]   ;;  %v5017_v34 = vld [vmem:[#allocation7 + $0x3e4] ss:$8 sps:$4 sm:$0xff]  }
 0x10f   :  { %v303_v37 = vpop.f32.mrf.mxu0 }
 0x110   :  { %v304_v38 = vadd.f32 %v303_v37, %v5734_v33  ;;  %v384_v39 = vpack.c.bf16 %v379_v36, %v379_v36  ;;  %v5012_v36 = vld [vmem:[#allocation7 + $0x2d0] ss:$8 sps:$4 sm:$0xff]   ;;  %v5015_v37 = vld [vmem:[#allocation7 + $0x3e0] ss:$8 sps:$4 sm:$0xff]  }
 0x111   :  { %v305_v42 = vpop.f32.mrf.mxu0 }
 0x112   :  { %v306_v44 = vadd.f32 %v305_v42, %v5737_v35  ;;  %900 = vmatprep.mubr.bf16.mxu1 %v384_v39  ;;  %v380_v45 = vmax.f32 %v304_v38, 0.0  ;;  %v5020_v38 = vld [vmem:[#allocation7 + $0x2c4] ss:$8 sps:$4 sm:$0xff]   ;;  %v5023_v39 = vld [vmem:[#allocation7 + $0x3d4] ss:$8 sps:$4 sm:$0xff]  }
 0x113   :  { %901 = vmatmul.mubr.bf16.vlgmr.msra.gmra.mxu1 %v383_v41  ;;  %v5021_v41 = vld [vmem:[#allocation7 + $0x3d0] ss:$8 sps:$4 sm:$0xff]   ;;  %v5026_v42 = vld [vmem:[#allocation7 + $0x2b4] ss:$8 sps:$4 sm:$0xff]  }
 0x114   :  { %v381_v46 = vmax.f32 %v306_v44, 0.0  ;;  %951 = vmatpush1.bf16.msra.mxu1 %v4976_v40  ;;  %982 = vmatprep.mubr.bf16.mxu1 %v5629_v48  ;;  %v385_v52 = vpack.c.bf16 %v380_v45, %v380_v45  ;;  %v5018_v40 = vld [vmem:[#allocation7 + $0x2c0] ss:$8 sps:$4 sm:$0xff]   ;;  %v5024_v44 = vld [vmem:[#allocation7 + $0x2b0] ss:$8 sps:$4 sm:$0xff]  }
 0x115   :  { %952 = vmatprep.subr.bf16.mxu1 %v4984_v43  ;;  %v374_v50 = vpop.f32.mrf.mxu0  ;;  %v5029_v43 = vld [vmem:[#allocation7 + $0x3c4] ss:$8 sps:$4 sm:$0xff]   ;;  %v5027_v45 = vld [vmem:[#allocation7 + $0x3c0] ss:$8 sps:$4 sm:$0xff]  }
 0x116   :  { %v386_v51 = vpack.c.bf16 %v381_v46, %v381_v46  ;;  %v375_v14 = vadd.f32 %v374_v50, %v5777_v8  ;;  %v5032_v46 = vld [vmem:[#allocation7 + $0x2a4] ss:$8 sps:$4 sm:$0xff]   ;;  %v5033_v50 = vld [vmem:[#allocation7 + $0x3b0] ss:$8 sps:$4 sm:$0xff]  }
 0x117   :  { %v4834_v53 = vpop.f32.mrf.mxu0 }
 0x118   :  { %953 = vmatpush1.bf16.msra.mxu1 %v4982_v47  ;;  %941 = vmatprep.mubr.bf16.mxu0 %v386_v51  ;;  %v382_v20 = vmax.f32 %v375_v14, 0.0  ;;  %v5035_v47 = vld [vmem:[#allocation7 + $0x3b4] ss:$8 sps:$4 sm:$0xff]   ;;  %v5036_v53 = vld [vmem:[#allocation7 + $0x290] ss:$8 sps:$4 sm:$0xff]  }
 0x119   :  { %942 = vmatmul.mubr.bf16.vlgmr.msra.gmra.mxu0 %v385_v52  ;;  %954 = vmatprep.subr.bf16.mxu1 %v4987_v49  ;;  %v5030_v49 = vld [vmem:[#allocation7 + $0x2a0] ss:$8 sps:$4 sm:$0xff]   ;;  %v5038_v51 = vld [vmem:[#allocation7 + $0x294] ss:$8 sps:$4 sm:$0xff]   ;;  %v5041_v52 = vld [vmem:[#allocation7 + $0x3a4] ss:$8 sps:$4 sm:$0xff]  }
 0x11a   :  { %4451 = vmatpush1.msk.msra.mxu0 %vm150_vm0, %v5742_v56  ;;  %1062 = vmatprep.mubr.f32.mxu0 %v5627_v1  ;;  %v387_v29 = vpack.c.bf16 %v382_v20, %v382_v20  ;;  %v5059_v14 = vld [vmem:[#allocation7 + $0x474] ss:$8 sps:$4 sm:$0xff]   ;;  %v5060_v20 = vld [vmem:[#allocation7 + $0x350] ss:$8 sps:$4 sm:$0xff]  }
 0x11b   :  { %1026 = vmatprep.subr.mxu0 %v5747_v57 }
 0x11c   :  { %955 = vmatpush1.bf16.msra.mxu1 %v4985_v54  ;;  %1027 = vmatpush1.msra.mxu0 %v5750_v58  ;;  %v5039_v54 = vld [vmem:[#allocation7 + $0x3a0] ss:$8 sps:$4 sm:$0xff]  }
 0x11d   :  { %956 = vmatprep.subr.bf16.mxu1 %v4990_v55  ;;  %1028 = vmatprep.subr.mxu0 %v5753_v60  ;;  %v5044_v55 = vld [vmem:[#allocation7 + $0x284] ss:$8 sps:$4 sm:$0xff]  }
 0x11e   :  { %1029 = vmatpush1.msra.mxu0 %v5756_v62 }
 0x11f   :  { %4453 = vmatprep.subr.msk.mxu0 %vm150_vm0, %v5762_v0 }
 0x120   :  { %957 = vmatpush1.bf16.msra.mxu1 %v4988_v59  ;;  %v5047_v59 = vld [vmem:[#allocation7 + $0x394] ss:$8 sps:$4 sm:$0xff]  }
 0x121   :  { %4452 = vmatmul.mubr.msk.f32.vlgmr.msra.gmra.mxu0 %vm146_vm1, %v4449_v63  ;;  %958 = vmatprep.subr.bf16.mxu1 %v4993_v61  ;;  %v5042_v61 = vld [vmem:[#allocation7 + $0x280] ss:$8 sps:$4 sm:$0xff]  }
 0x122   :  { %4454 = vmatpush1.msk.msra.mxu0 %vm150_vm0, %v5768_v6  ;;  %1133 = vmatprep.mubr.f32.mxu0 %v5627_v1 }
 0x123   :  { %1097 = vmatprep.subr.mxu0 %v5773_v7 }
 0x124   :  { %959 = vmatpush1.bf16.msra.mxu1 %v4991_v4  ;;  %1098 = vmatpush1.msra.mxu0 %v5779_v9  ;;  %v5053_v4 = vld [vmem:[#allocation7 + $0x384] ss:$8 sps:$4 sm:$0xff]  }
 0x125   :  { %1099 = vmatprep.subr.mxu0 %v5782_v11  ;;  %960 = vmatprep.subr.bf16.mxu1 %v4996_v5  ;;  %v5048_v5 = vld [vmem:[#allocation7 + $0x370] ss:$8 sps:$4 sm:$0xff]  }
 0x126   :  { %1100 = vmatpush1.msra.mxu0 %v5785_v13 }
 0x127   :  { %4455 = vmatmul.mubr.msk.f32.vlgmr.msra.gmra.mxu0 %vm146_vm1, %v4449_v63  ;;  %4835 = vmatprep.subr.mxu0 %v5627_v1 }
 0x128   :  { %961 = vmatpush1.bf16.msra.mxu1 %v4994_v10  ;;  %4836 = vmatpush3.msk.msra.mxu0 %vm150_vm0, %v5791_v16  ;;  %v5051_v10 = vld [vmem:[#allocation7 + $0x380] ss:$8 sps:$4 sm:$0xff]  }
 0x129   :  { %962 = vmatprep.subr.bf16.mxu1 %v4999_v12  ;;  %4837 = vmatprep.subr.mxu0 %v5627_v1  ;;  %v5056_v12 = vld [vmem:[#allocation7 + $0x364] ss:$8 sps:$4 sm:$0xff]  }
 0x12a   :  { %4838 = vmatpush3.msra.mxu0 %v5796_v18  ;;  %4841 = vmatprep.mubr.msk.f32.mxu0 %vm5628_vm2, %v5627_v1 }
 0x12b   :  { %4839 = vmatprep.subr.mxu0 %v5627_v1 }
 0x12c   :  { %963 = vmatpush1.bf16.msra.mxu1 %v4997_v15  ;;  %4840 = vmatpush3.msra.mxu0 %v5802_v24  ;;  %v5054_v15 = vld [vmem:[#allocation7 + $0x360] ss:$8 sps:$4 sm:$0xff]  }
 0x12d   :  { %964 = vmatprep.subr.bf16.mxu1 %v5002_v17  ;;  %4842 = vmatmul.mubr.msk.f32.vlgmr.msra.gmra.mxu0 %vm146_vm1, %v4449_v63  ;;  %v5045_v63 = vld [vmem:[#allocation7 + $0x390] ss:$8 sps:$4 sm:$0xff]  }
 0x12e   :  { %1701 = vmatprep.subr.bf16.mxu0 %v5005_v19  ;;  %v5057_v17 = vld [vmem:[#allocation7 + $0x470] ss:$8 sps:$4 sm:$0xff]   ;;  %v5062_v19 = vld [vmem:[#allocation7 + $0x354] ss:$8 sps:$4 sm:$0xff]  }
 0x12f   :  { %1702 = vmatpush1.bf16.msra.mxu0 %v5003_v21  ;;  %v5065_v21 = vld [vmem:[#allocation7 + $0x464] ss:$8 sps:$4 sm:$0xff]  }
 0x130   :  { %965 = vmatpush1.bf16.msra.mxu1 %v5000_v22  ;;  %1703 = vmatprep.subr.bf16.mxu0 %v5008_v2  ;;  %v5063_v22 = vld [vmem:[#allocation7 + $0x460] ss:$8 sps:$4 sm:$0xff]   ;;  %v5068_v2 = vld [vmem:[#allocation7 + $0x344] ss:$8 sps:$4 sm:$0xff]  }
 0x131   :  { %1742 = vmatprep.subr.bf16.mxu1 %v5011_v28  ;;  %v5066_v28 = vld [vmem:[#allocation7 + $0x340] ss:$8 sps:$4 sm:$0xff]  }
 0x133   :  { %983 = vmatmul.mubr.bf16.vlgmr.msra.gmra.mxu1 %v387_v29  ;;  %1704 = vmatpush1.bf16.msra.mxu0 %v5006_v30  ;;  %v5071_v29 = vld [vmem:[#allocation7 + $0x454] ss:$8 sps:$4 sm:$0xff]   ;;  %v5069_v30 = vld [vmem:[#allocation7 + $0x450] ss:$8 sps:$4 sm:$0xff]  }
 0x134   :  { %1743 = vmatpush1.bf16.msra.mxu1 %v5009_v31  ;;  %1705 = vmatprep.subr.bf16.mxu0 %v5014_v32  ;;  %v5074_v31 = vld [vmem:[#allocation7 + $0x334] ss:$8 sps:$4 sm:$0xff]   ;;  %v5072_v32 = vld [vmem:[#allocation7 + $0x330] ss:$8 sps:$4 sm:$0xff]  }
 0x135   :  { %1744 = vmatprep.subr.bf16.mxu1 %v5017_v34  ;;  %v5077_v34 = vld [vmem:[#allocation7 + $0x444] ss:$8 sps:$4 sm:$0xff]  }
 0x137   :  { %1706 = vmatpush1.bf16.msra.mxu0 %v5012_v36  ;;  %v5075_v36 = vld [vmem:[#allocation7 + $0x440] ss:$8 sps:$4 sm:$0xff]  }
 0x138   :  { %1745 = vmatpush1.bf16.msra.mxu1 %v5015_v37  ;;  %1707 = vmatprep.subr.bf16.mxu0 %v5020_v38  ;;  %v5080_v37 = vld [vmem:[#allocation7 + $0x324] ss:$8 sps:$4 sm:$0xff]   ;;  %v5078_v38 = vld [vmem:[#allocation7 + $0x320] ss:$8 sps:$4 sm:$0xff]  }
 0x139   :  { %1746 = vmatprep.subr.bf16.mxu1 %v5023_v39  ;;  %v5083_v39 = vld [vmem:[#allocation7 + $0x434] ss:$8 sps:$4 sm:$0xff]  }
 0x13b   :  { %1708 = vmatpush1.bf16.msra.mxu0 %v5018_v40  ;;  %v5081_v40 = vld [vmem:[#allocation7 + $0x430] ss:$8 sps:$4 sm:$0xff]  }
 0x13c   :  { %1747 = vmatpush1.bf16.msra.mxu1 %v5021_v41  ;;  %1709 = vmatprep.subr.bf16.mxu0 %v5026_v42  ;;  %v5086_v41 = vld [vmem:[#allocation7 + $0x314] ss:$8 sps:$4 sm:$0xff]   ;;  %v5084_v42 = vld [vmem:[#allocation7 + $0x310] ss:$8 sps:$4 sm:$0xff]  }
 0x13d   :  { %1748 = vmatprep.subr.bf16.mxu1 %v5029_v43  ;;  %v5089_v43 = vld [vmem:[#allocation7 + $0x424] ss:$8 sps:$4 sm:$0xff]  }
 0x13f   :  { %1710 = vmatpush1.bf16.msra.mxu0 %v5024_v44  ;;  %v5087_v44 = vld [vmem:[#allocation7 + $0x420] ss:$8 sps:$4 sm:$0xff]  }
 0x140   :  { %1749 = vmatpush1.bf16.msra.mxu1 %v5027_v45  ;;  %1711 = vmatprep.subr.bf16.mxu0 %v5032_v46  ;;  %v5092_v45 = vld [vmem:[#allocation7 + $0x304] ss:$8 sps:$4 sm:$0xff]   ;;  %v5090_v46 = vld [vmem:[#allocation7 + $0x300] ss:$8 sps:$4 sm:$0xff]  }
 0x141   :  { %1750 = vmatprep.subr.bf16.mxu1 %v5035_v47  ;;  %v5095_v47 = vld [vmem:[#allocation7 + $0x414] ss:$8 sps:$4 sm:$0xff]  }
 0x143   :  { %1712 = vmatpush1.bf16.msra.mxu0 %v5030_v49  ;;  %v5093_v49 = vld [vmem:[#allocation7 + $0x410] ss:$8 sps:$4 sm:$0xff]  }
 0x144   :  { %1751 = vmatpush1.bf16.msra.mxu1 %v5033_v50  ;;  %1713 = vmatprep.subr.bf16.mxu0 %v5038_v51  ;;  %v5098_v50 = vld [vmem:[#allocation7 + $0x4f4] ss:$8 sps:$4 sm:$0xff]   ;;  %v5101_v51 = vld [vmem:[#allocation7 + $0x404] ss:$8 sps:$4 sm:$0xff]  }
 0x145   :  { %1752 = vmatprep.subr.bf16.mxu1 %v5041_v52  ;;  %v5099_v52 = vld [vmem:[#allocation7 + $0x400] ss:$8 sps:$4 sm:$0xff]  }
 0x147   :  { %1714 = vmatpush1.bf16.msra.mxu0 %v5036_v53 }
 0x148   :  { %1753 = vmatpush1.bf16.msra.mxu1 %v5039_v54  ;;  %1715 = vmatprep.subr.bf16.mxu0 %v5044_v55 }
 0x149   :  { %1754 = vmatprep.subr.bf16.mxu1 %v5047_v59 }
 0x14b   :  { %1716 = vmatpush1.bf16.msra.mxu0 %v5042_v61 }
 0x14c   :  { %1755 = vmatpush1.bf16.msra.mxu1 %v5045_v63  ;;  %1717 = vmatprep.subr.bf16.mxu0 %v5050_v3 }
 0x14d   :  { %1756 = vmatprep.subr.bf16.mxu1 %v5053_v4 }
 0x14f   :  { %1718 = vmatpush2.bf16.msra.mxu0 %v5048_v5 }
 0x150   :  { %1757 = vmatpush1.bf16.msra.mxu1 %v5051_v10  ;;  %1719 = vmatprep.subr.bf16.mxu0 %v5056_v12 }
 0x151   :  { %1758 = vmatprep.subr.bf16.mxu1 %v5059_v14 }
 0x153   :  { %1720 = vmatpush2.bf16.msra.mxu0 %v5054_v15 }
 0x154   :  { %1759 = vmatpush2.bf16.msra.mxu1 %v5057_v17  ;;  %1721 = vmatprep.subr.bf16.mxu0 %v5062_v19 }
 0x155   :  { %1760 = vmatprep.subr.bf16.mxu1 %v5065_v21 }
 0x157   :  { %1722 = vmatpush2.bf16.msra.mxu0 %v5060_v20 }
 0x158   :  { %1761 = vmatpush2.bf16.msra.mxu1 %v5063_v22  ;;  %1723 = vmatprep.subr.bf16.mxu0 %v5068_v2 }
 0x159   :  { %1762 = vmatprep.subr.bf16.mxu1 %v5071_v29 }
 0x15b   :  { %1724 = vmatpush2.bf16.msra.mxu0 %v5066_v28  ;;  %v5096_v28 = vld [vmem:[#allocation7 + $0x4f0] ss:$8 sps:$4 sm:$0xff]  }
 0x15c   :  { %1763 = vmatpush2.bf16.msra.mxu1 %v5069_v30  ;;  %1725 = vmatprep.subr.bf16.mxu0 %v5074_v31  ;;  %v5104_v31 = vld [vmem:[#allocation7 + $0x4e4] ss:$8 sps:$4 sm:$0xff]  }
 0x15d   :  { %1764 = vmatprep.subr.bf16.mxu1 %v5077_v34 }
 0x15f   :  { %1726 = vmatpush2.bf16.msra.mxu0 %v5072_v32 }
 0x160   :  { %1765 = vmatpush2.bf16.msra.mxu1 %v5075_v36  ;;  %1727 = vmatprep.subr.bf16.mxu0 %v5080_v37  ;;  %v5102_v37 = vld [vmem:[#allocation7 + $0x4e0] ss:$8 sps:$4 sm:$0xff]  }
 0x161   :  { %1766 = vmatprep.subr.bf16.mxu1 %v5083_v39 }
 0x163   :  { %1728 = vmatpush2.bf16.msra.mxu0 %v5078_v38  ;;  %v5107_v38 = vld [vmem:[#allocation7 + $0x4d4] ss:$8 sps:$4 sm:$0xff]  }
 0x164   :  { %1767 = vmatpush2.bf16.msra.mxu1 %v5081_v40  ;;  %1729 = vmatprep.subr.bf16.mxu0 %v5086_v41 }
 0x165   :  { %1768 = vmatprep.subr.bf16.mxu1 %v5089_v43  ;;  %v5105_v43 = vld [vmem:[#allocation7 + $0x4d0] ss:$8 sps:$4 sm:$0xff]  }
 0x167   :  { %1730 = vmatpush2.bf16.msra.mxu0 %v5084_v42 }
 0x168   :  { %1769 = vmatpush2.bf16.msra.mxu1 %v5087_v44  ;;  %1731 = vmatprep.subr.bf16.mxu0 %v5092_v45  ;;  %v5110_v44 = vld [vmem:[#allocation7 + $0x4c4] ss:$8 sps:$4 sm:$0xff]  }
 0x169   :  { %1770 = vmatprep.subr.bf16.mxu1 %v5095_v47  ;;  %v5108_v47 = vld [vmem:[#allocation7 + $0x4c0] ss:$8 sps:$4 sm:$0xff]  }
 0x16b   :  { %1732 = vmatpush2.bf16.msra.mxu0 %v5090_v46 }
 0x16c   :  { %1771 = vmatpush2.bf16.msra.mxu1 %v5093_v49  ;;  %1783 = vmatprep.subr.bf16.mxu0 %v5098_v50  ;;  %v5113_v50 = vld [vmem:[#allocation7 + $0x4b4] ss:$8 sps:$4 sm:$0xff]  }
 0x16d   :  { %1772 = vmatprep.subr.bf16.mxu1 %v5101_v51 }
 0x170   :  { %1773 = vmatpush2.bf16.msra.mxu1 %v5099_v52  ;;  %v4538_v52 = vld [vmem:[%s5951_s0 + $0x10] sm:$0xff] }
 0x171   :  { %4542 = vmatprep.subr.msk.mxu1 %vm150_vm0, %v5762_v0 }
 0x1d3   :  { %v902_v53 = vpop.f32.mrf.mxu1 }
 0x1d5   :  { %v904_v54 = vpop.f32.mrf.mxu1 }
 0x1d7   :  { %v906_v55 = vpop.f32.mrf.mxu1 }
 0x1d8   :  { %v5116_v55 = vld [vmem:[#allocation7 + $0x4a4] ss:$8 sps:$4 sm:$0xff]  }
 0x1d9   :  { %v907_v59 = vpop.f32.mrf.mxu1  ;;  %v943_v61 = vpop.f32.mrf.mxu0 }
 0x1da   :  { %v944_v63 = vadd.f32 %v943_v61, %v902_v53  ;;  %v5146_v61 = vld [vmem:[#allocation7 + $0x574] ss:$8 sps:$4 sm:$0xff]  }
 0x1db   :  { %v945_v3 = vpop.f32.mrf.mxu0 }
 0x1dc   :  { %v946_v4 = vadd.f32 %v945_v3, %v904_v54  ;;  %v5111_v54 = vld [vmem:[#allocation7 + $0x4b0] ss:$8 sps:$4 sm:$0xff]  }
 0x1dd   :  { %v947_v5 = vpop.f32.mrf.mxu0  ;;  %v5144_v3 = vld [vmem:[#allocation7 + $0x570] ss:$8 sps:$4 sm:$0xff]  }
 0x1de   :  { %v5152_v5 = vld [vmem:[#allocation7 + $0x564] ss:$8 sps:$4 sm:$0xff]  }
 0x1df   :  { %v948_v10 = vpop.f32.mrf.mxu0 }
 0x1e1   :  { %v1064_v12 = vpop.f32.mrf.mxu0 }
 0x1e2   :  { %v1065_v14 = vadd.f32 %v1064_v12, %v5723_v26  ;;  %v5117_v12 = vld [vmem:[#allocation7 + $0x490] ss:$8 sps:$4 sm:$0xff]  }
 0x1e3   :  { %v1066_v15 = vpop.f32.mrf.mxu0 }
 0x1e4   :  { %v1067_v17 = vadd.f32 %v1066_v15, %v5727_v27  ;;  %v1210_v19 = vmax.f32 %v1065_v14, 0.0  ;;  %v5150_v14 = vld [vmem:[#allocation7 + $0x560] ss:$8 sps:$4 sm:$0xff]   ;;  %v5122_v15 = vld [vmem:[#allocation7 + $0x484] ss:$8 sps:$4 sm:$0xff]  }
 0x1e6   :  { %v1211_v20 = vmax.f32 %v1067_v17, 0.0  ;;  %v1215_v29 = vpack.c.bf16 %v1210_v19, %v1210_v19  ;;  %v5158_v17 = vld [vmem:[#allocation7 + $0x554] ss:$8 sps:$4 sm:$0xff]  }
 0x1e7   :  { %v1135_v21 = vpop.f32.mrf.mxu0 }
 0x1e8   :  { %v1216_v22 = vpack.c.bf16 %v1211_v20, %v1211_v20  ;;  %v1136_v2 = vadd.f32 %v1135_v21, %v5734_v33  ;;  %v5120_v20 = vld [vmem:[#allocation7 + $0x480] ss:$8 sps:$4 sm:$0xff]   ;;  %v5156_v21 = vld [vmem:[#allocation7 + $0x550] ss:$8 sps:$4 sm:$0xff]  }
 0x1e9   :  { %v1137_v30 = vpop.f32.mrf.mxu0 }
 0x1ea   :  { %v1138_v32 = vadd.f32 %v1137_v30, %v5737_v35  ;;  %1733 = vmatprep.mubr.bf16.mxu0 %v1216_v22  ;;  %v1212_v34 = vmax.f32 %v1136_v2, 0.0  ;;  %v5164_v22 = vld [vmem:[#allocation7 + $0x544] ss:$8 sps:$4 sm:$0xff]   ;;  %v5125_v30 = vld [vmem:[#allocation7 + $0x674] ss:$8 sps:$4 sm:$0xff]  }
 0x1eb   :  { %1734 = vmatmul.mubr.bf16.vlgmr.msra.gmra.mxu0 %v1215_v29  ;;  %v5162_v29 = vld [vmem:[#allocation7 + $0x540] ss:$8 sps:$4 sm:$0xff]  }
 0x1ec   :  { %v1213_v36 = vmax.f32 %v1138_v32, 0.0  ;;  %1784 = vmatpush1.bf16.msra.mxu0 %v5096_v28  ;;  %1815 = vmatprep.mubr.bf16.mxu0 %v5629_v48  ;;  %v1217_v41 = vpack.c.bf16 %v1212_v34, %v1212_v34  ;;  %v5839_v28 = vld [vmem:[#allocation3 + $0x58] sm:$0xf]  ;;  %v5128_v32 = vld [vmem:[#allocation7 + $0x664] ss:$8 sps:$4 sm:$0xff]  }
 0x1ed   :  { %1785 = vmatprep.subr.bf16.mxu0 %v5104_v31  ;;  %v1206_v39 = vpop.f32.mrf.mxu0  ;;  %v5123_v31 = vld [vmem:[#allocation7 + $0x670] ss:$8 sps:$4 sm:$0xff]   ;;  %v5126_v34 = vld [vmem:[#allocation7 + $0x660] ss:$8 sps:$4 sm:$0xff]  }
 0x1ee   :  { %v1218_v40 = vpack.c.bf16 %v1213_v36, %v1213_v36  ;;  %v1207_v10 = vadd.f32 %v1206_v39, %v5777_v8  ;;  %v5131_v36 = vld [vmem:[#allocation7 + $0x654] ss:$8 sps:$4 sm:$0xff]   ;;  %v5132_v39 = vld [vmem:[#allocation7 + $0x640] ss:$8 sps:$4 sm:$0xff]  }
 0x1ef   :  { %v4843_v42 = vpop.f32.mrf.mxu0 }
 0x1f0   :  { %1774 = vmatprep.mubr.bf16.mxu1 %v1218_v40  ;;  %1786 = vmatpush1.bf16.msra.mxu0 %v5102_v37  ;;  %v1214_v19 = vmax.f32 %v1207_v10, 0.0  ;;  %v5129_v37 = vld [vmem:[#allocation7 + $0x650] ss:$8 sps:$4 sm:$0xff]   ;;  %v5137_v40 = vld [vmem:[#allocation7 + $0x634] ss:$8 sps:$4 sm:$0xff]  }
 0x1f1   :  { %1775 = vmatmul.mubr.bf16.vlgmr.msra.gmra.mxu1 %v1217_v41  ;;  %1787 = vmatprep.subr.bf16.mxu0 %v5107_v38  ;;  %v5134_v38 = vld [vmem:[#allocation7 + $0x644] ss:$8 sps:$4 sm:$0xff]   ;;  %v5135_v41 = vld [vmem:[#allocation7 + $0x630] ss:$8 sps:$4 sm:$0xff]  }
 0x1f2   :  { %4543 = vmatpush1.msk.msra.mxu1 %vm150_vm0, %v5768_v6  ;;  %1966 = vmatprep.mubr.f32.mxu1 %v5627_v1  ;;  %v1219_v2 = vpack.c.bf16 %v1214_v19, %v1214_v19  ;;  %v5140_v42 = vld [vmem:[#allocation7 + $0x624] ss:$8 sps:$4 sm:$0xff]   ;;  %v5192_v19 = vld [vmem:[#allocation7 + $0x5f0] ss:$8 sps:$4 sm:$0xff]  }
 0x1f3   :  { %v984_v45 = vpop.f32.mrf.mxu1  ;;  %1930 = vmatprep.subr.mxu1 %v5773_v7  ;;  %v5188_v10 = vld [vmem:[#allocation7 + $0x504] ss:$8 sps:$4 sm:$0xff]  }
 0x1f4   :  { %v5817_v46 = vadd.f32 %v984_v45, %v944_v63  ;;  %1788 = vmatpush1.bf16.msra.mxu0 %v5105_v43  ;;  %1931 = vmatpush1.msra.mxu1 %v5779_v9  ;;  %v5114_v63 = vld [vmem:[#allocation7 + $0x4a0] ss:$8 sps:$4 sm:$0xff]   ;;  %v5141_v45 = vld [vmem:[#allocation7 + $0x610] ss:$8 sps:$4 sm:$0xff]  }
 0x1f5   :  { %v986_v49 = vpop.f32.mrf.mxu1  ;;  %1932 = vmatprep.subr.mxu1 %v5782_v11  ;;  %1789 = vmatprep.subr.bf16.mxu0 %v5110_v44  ;;  %v5138_v43 = vld [vmem:[#allocation7 + $0x620] ss:$8 sps:$4 sm:$0xff]   ;;  %v5143_v44 = vld [vmem:[#allocation7 + $0x614] ss:$8 sps:$4 sm:$0xff]  }
 0x1f6   :  { %v5821_v51 = vadd.f32 %v986_v49, %v946_v4  ;;  %1933 = vmatpush1.msra.mxu1 %v5785_v13  ;;  %v5119_v4 = vld [vmem:[#allocation7 + $0x494] ss:$8 sps:$4 sm:$0xff]  }
 0x1f7   :  { %4844 = vmatprep.subr.mxu1 %v5627_v1  ;;  %v988_v53 = vpop.f32.mrf.mxu1  ;;  %v5170_v49 = vld [vmem:[#allocation7 + $0x534] ss:$8 sps:$4 sm:$0xff]  }
 0x1f8   :  { %1790 = vmatpush1.bf16.msra.mxu0 %v5108_v47  ;;  %v5149_v47 = vld [vmem:[#allocation7 + $0x604] ss:$8 sps:$4 sm:$0xff]   ;;  %v5155_v53 = vld [vmem:[#allocation7 + $0x6f4] ss:$8 sps:$4 sm:$0xff]  }
 0x1f9   :  { %4544 = vmatmul.mubr.msk.f32.vlgmr.msra.gmra.mxu1 %vm146_vm1, %v4538_v52  ;;  %1791 = vmatprep.subr.bf16.mxu0 %v5113_v50  ;;  %v989_v59 = vpop.f32.mrf.mxu1  ;;  %v5168_v50 = vld [vmem:[#allocation7 + $0x530] ss:$8 sps:$4 sm:$0xff]  }
 0x1fa   :  { %4845 = vmatpush3.msk.msra.mxu1 %vm150_vm0, %v5791_v16  ;;  %4850 = vmatprep.mubr.msk.f32.mxu1 %vm5628_vm2, %v5627_v1  ;;  %v5153_v59 = vld [vmem:[#allocation7 + $0x6f0] ss:$8 sps:$4 sm:$0xff]  }
 0x1fb   :  { %4846 = vmatprep.subr.mxu1 %v5627_v1 }
 0x1fc   :  { %1792 = vmatpush1.bf16.msra.mxu0 %v5111_v54  ;;  %4847 = vmatpush3.msra.mxu1 %v5796_v18  ;;  %v5176_v54 = vld [vmem:[#allocation7 + $0x524] ss:$8 sps:$4 sm:$0xff]  }
 0x1fd   :  { %1793 = vmatprep.subr.bf16.mxu0 %v5116_v55  ;;  %4848 = vmatprep.subr.mxu1 %v5627_v1  ;;  %v5174_v55 = vld [vmem:[#allocation7 + $0x520] ss:$8 sps:$4 sm:$0xff]  }
 0x1fe   :  { %4849 = vmatpush3.msra.mxu1 %v5802_v24 }
 0x1ff   :  { %4851 = vmatmul.mubr.msk.f32.vlgmr.msra.gmra.mxu1 %vm146_vm1, %v4538_v52  ;;  %2534 = vmatprep.subr.bf16.mxu1 %v5146_v61  ;;  %v5161_v61 = vld [vmem:[#allocation7 + $0x6e4] ss:$8 sps:$4 sm:$0xff]  }
 0x200   :  { %1794 = vmatpush1.bf16.msra.mxu0 %v5114_v63  ;;  %2535 = vmatpush1.bf16.msra.mxu1 %v5144_v3  ;;  %v5182_v63 = vld [vmem:[#allocation7 + $0x514] ss:$8 sps:$4 sm:$0xff]   ;;  %v5180_v3 = vld [vmem:[#allocation7 + $0x510] ss:$8 sps:$4 sm:$0xff]  }
 0x201   :  { %1795 = vmatprep.subr.bf16.mxu0 %v5119_v4  ;;  %2536 = vmatprep.subr.bf16.mxu1 %v5152_v5  ;;  %v5159_v4 = vld [vmem:[#allocation7 + $0x6e0] ss:$8 sps:$4 sm:$0xff]   ;;  %v5167_v5 = vld [vmem:[#allocation7 + $0x6d4] ss:$8 sps:$4 sm:$0xff]  }
 0x204   :  { %1796 = vmatpush1.bf16.msra.mxu0 %v5117_v12  ;;  %2537 = vmatpush1.bf16.msra.mxu1 %v5150_v14  ;;  %v5186_v12 = vld [vmem:[#allocation7 + $0x500] ss:$8 sps:$4 sm:$0xff]   ;;  %v5165_v14 = vld [vmem:[#allocation7 + $0x6d0] ss:$8 sps:$4 sm:$0xff]  }
 0x205   :  { %1797 = vmatprep.subr.bf16.mxu0 %v5122_v15  ;;  %2538 = vmatprep.subr.bf16.mxu1 %v5158_v17  ;;  %v5173_v15 = vld [vmem:[#allocation7 + $0x6c4] ss:$8 sps:$4 sm:$0xff]   ;;  %v5194_v17 = vld [vmem:[#allocation7 + $0x5f4] ss:$8 sps:$4 sm:$0xff]  }
 0x208   :  { %1798 = vmatpush1.bf16.msra.mxu0 %v5120_v20  ;;  %2539 = vmatpush1.bf16.msra.mxu1 %v5156_v21  ;;  %v5171_v20 = vld [vmem:[#allocation7 + $0x6c0] ss:$8 sps:$4 sm:$0xff]   ;;  %v5179_v21 = vld [vmem:[#allocation7 + $0x6b4] ss:$8 sps:$4 sm:$0xff]  }
 0x209   :  { %4539 = vmatprep.subr.msk.mxu0 %vm150_vm0, %v5839_v28  ;;  %2540 = vmatprep.subr.bf16.mxu1 %v5164_v22  ;;  %v5200_v22 = vld [vmem:[#allocation7 + $0x5e4] ss:$8 sps:$4 sm:$0xff]  }
 0x20b   :  { %1816 = vmatmul.mubr.bf16.vlgmr.msra.gmra.mxu0 %v1219_v2  ;;  %v5198_v2 = vld [vmem:[#allocation7 + $0x5e0] ss:$8 sps:$4 sm:$0xff]  }
 0x20c   :  { %4540 = vmatpush1.msk.msra.mxu0 %vm150_vm0, %v5742_v56  ;;  %1895 = vmatprep.mubr.f32.mxu0 %v5627_v1 }
 0x20d   :  { %1859 = vmatprep.subr.mxu0 %v5747_v57  ;;  %2541 = vmatpush1.bf16.msra.mxu1 %v5162_v29  ;;  %v5177_v29 = vld [vmem:[#allocation7 + $0x6b0] ss:$8 sps:$4 sm:$0xff]  }
 0x20e   :  { %1860 = vmatpush1.msra.mxu0 %v5750_v58  ;;  %2542 = vmatprep.subr.bf16.mxu1 %v5170_v49  ;;  %v5213_v49 = vld [vmem:[#allocation7 + $0x590] ss:$8 sps:$4 sm:$0xff]  }
 0x20f   :  { %1861 = vmatprep.subr.mxu0 %v5753_v60 }
 0x210   :  { %1862 = vmatpush1.msra.mxu0 %v5756_v62 }
 0x211   :  { %2575 = vmatprep.subr.bf16.mxu0 %v5125_v30  ;;  %2543 = vmatpush1.bf16.msra.mxu1 %v5168_v50  ;;  %v5185_v30 = vld [vmem:[#allocation7 + $0x6a4] ss:$8 sps:$4 sm:$0xff]  }
 0x212   :  { %2544 = vmatprep.subr.bf16.mxu1 %v5176_v54  ;;  %v5218_v50 = vld [vmem:[#allocation7 + $0x584] ss:$8 sps:$4 sm:$0xff]  }
 0x213   :  { %4541 = vmatmul.mubr.msk.f32.vlgmr.msra.gmra.mxu0 %vm146_vm1, %v4538_v52  ;;  %v5147_v52 = vld [vmem:[#allocation7 + $0x600] ss:$8 sps:$4 sm:$0xff]  }
 0x214   :  { %2576 = vmatpush1.bf16.msra.mxu0 %v5123_v31  ;;  %v5203_v31 = vld [vmem:[#allocation7 + $0x5d4] ss:$8 sps:$4 sm:$0xff]  }
 0x215   :  { %2577 = vmatprep.subr.bf16.mxu0 %v5128_v32  ;;  %2545 = vmatpush1.bf16.msra.mxu1 %v5174_v55  ;;  %v5201_v32 = vld [vmem:[#allocation7 + $0x5d0] ss:$8 sps:$4 sm:$0xff]  }
 0x216   :  { %2546 = vmatprep.subr.bf16.mxu1 %v5182_v63 }
 0x218   :  { %2578 = vmatpush1.bf16.msra.mxu0 %v5126_v34  ;;  %v5183_v34 = vld [vmem:[#allocation7 + $0x6a0] ss:$8 sps:$4 sm:$0xff]  }
 0x219   :  { %2579 = vmatprep.subr.bf16.mxu0 %v5131_v36  ;;  %2547 = vmatpush1.bf16.msra.mxu1 %v5180_v3  ;;  %v5191_v36 = vld [vmem:[#allocation7 + $0x694] ss:$8 sps:$4 sm:$0xff]  }
 0x21a   :  { %2548 = vmatprep.subr.bf16.mxu1 %v5188_v10 }
 0x21c   :  { %2580 = vmatpush1.bf16.msra.mxu0 %v5129_v37  ;;  %v5204_v37 = vld [vmem:[#allocation7 + $0x5c0] ss:$8 sps:$4 sm:$0xff]  }
 0x21d   :  { %2581 = vmatprep.subr.bf16.mxu0 %v5134_v38  ;;  %2549 = vmatpush1.bf16.msra.mxu1 %v5186_v12  ;;  %v5206_v38 = vld [vmem:[#allocation7 + $0x5c4] ss:$8 sps:$4 sm:$0xff]  }
 0x21e   :  { %2550 = vmatprep.subr.bf16.mxu1 %v5194_v17 }
 0x220   :  { %2582 = vmatpush1.bf16.msra.mxu0 %v5132_v39  ;;  %v5189_v39 = vld [vmem:[#allocation7 + $0x690] ss:$8 sps:$4 sm:$0xff]  }
 0x221   :  { %2583 = vmatprep.subr.bf16.mxu0 %v5137_v40  ;;  %2551 = vmatpush2.bf16.msra.mxu1 %v5192_v19  ;;  %v5197_v40 = vld [vmem:[#allocation7 + $0x684] ss:$8 sps:$4 sm:$0xff]  }
 0x222   :  { %2552 = vmatprep.subr.bf16.mxu1 %v5200_v22 }
 0x224   :  { %2584 = vmatpush1.bf16.msra.mxu0 %v5135_v41  ;;  %v5209_v41 = vld [vmem:[#allocation7 + $0x5b4] ss:$8 sps:$4 sm:$0xff]  }
 0x225   :  { %2585 = vmatprep.subr.bf16.mxu0 %v5140_v42  ;;  %2553 = vmatpush2.bf16.msra.mxu1 %v5198_v2  ;;  %v5195_v42 = vld [vmem:[#allocation7 + $0x680] ss:$8 sps:$4 sm:$0xff]  }
 0x226   :  { %2554 = vmatprep.subr.bf16.mxu1 %v5203_v31  ;;  %v107_v31 = vld [vmem:[#allocation8] sm:$0x3] }
 0x228   :  { %2586 = vmatpush1.bf16.msra.mxu0 %v5138_v43  ;;  %v5207_v43 = vld [vmem:[#allocation7 + $0x5b0] ss:$8 sps:$4 sm:$0xff]  }
 0x229   :  { %2587 = vmatprep.subr.bf16.mxu0 %v5143_v44  ;;  %2555 = vmatpush2.bf16.msra.mxu1 %v5201_v32  ;;  %v5212_v44 = vld [vmem:[#allocation7 + $0x5a4] ss:$8 sps:$4 sm:$0xff]   ;;  %v112_v32 = vrot.slane %v107_v31, %v5714_v23 }
 0x22a   :  { %2556 = vmatprep.subr.bf16.mxu1 %v5206_v38 }
 0x22c   :  { %2588 = vmatpush1.bf16.msra.mxu0 %v5141_v45  ;;  %v5210_v45 = vld [vmem:[#allocation7 + $0x5a0] ss:$8 sps:$4 sm:$0xff]  }
 0x22d   :  { %2589 = vmatprep.subr.bf16.mxu0 %v5149_v47  ;;  %2557 = vmatpush2.bf16.msra.mxu1 %v5204_v37  ;;  %v5215_v47 = vld [vmem:[#allocation7 + $0x594] ss:$8 sps:$4 sm:$0xff]  }
 0x22e   :  { %2558 = vmatprep.subr.bf16.mxu1 %v5209_v41 }
 0x230   :  { %2590 = vmatpush1.bf16.msra.mxu0 %v5147_v52  ;;  %v5216_v52 = vld [vmem:[#allocation7 + $0x580] ss:$8 sps:$4 sm:$0xff]  }
 0x231   :  { %2591 = vmatprep.subr.bf16.mxu0 %v5155_v53  ;;  %2559 = vmatpush2.bf16.msra.mxu1 %v5207_v43  ;;  %v5221_v53 = vld [vmem:[#allocation7 + $0x774] ss:$8 sps:$4 sm:$0xff]  }
 0x232   :  { %2560 = vmatprep.subr.bf16.mxu1 %v5212_v44  ;;  %v5254_v44 = vld [vmem:[#allocation7 + $0x7d4] ss:$8 sps:$4 sm:$0xff]  }
 0x234   :  { %2592 = vmatpush2.bf16.msra.mxu0 %v5153_v59 }
 0x235   :  { %2593 = vmatprep.subr.bf16.mxu0 %v5161_v61  ;;  %2561 = vmatpush2.bf16.msra.mxu1 %v5210_v45  ;;  %v5219_v45 = vld [vmem:[#allocation7 + $0x770] ss:$8 sps:$4 sm:$0xff]  }
 0x236   :  { %2562 = vmatprep.subr.bf16.mxu1 %v5215_v47  ;;  %v5224_v47 = vld [vmem:[#allocation7 + $0x764] ss:$8 sps:$4 sm:$0xff]  }
 0x238   :  { %2594 = vmatpush2.bf16.msra.mxu0 %v5159_v4 }
 0x239   :  { %2595 = vmatprep.subr.bf16.mxu0 %v5167_v5  ;;  %2563 = vmatpush2.bf16.msra.mxu1 %v5213_v49  ;;  %v5252_v49 = vld [vmem:[#allocation7 + $0x7d0] ss:$8 sps:$4 sm:$0xff]  }
 0x23a   :  { %2564 = vmatprep.subr.bf16.mxu1 %v5218_v50  ;;  %v5260_v50 = vld [vmem:[#allocation7 + $0x7c4] ss:$8 sps:$4 sm:$0xff]  }
 0x23c   :  { %2596 = vmatpush2.bf16.msra.mxu0 %v5165_v14 }
 0x23d   :  { %2597 = vmatprep.subr.bf16.mxu0 %v5173_v15  ;;  %2565 = vmatpush2.bf16.msra.mxu1 %v5216_v52  ;;  %v5227_v52 = vld [vmem:[#allocation7 + $0x754] ss:$8 sps:$4 sm:$0xff]  }
 0x23e   :  { %2616 = vmatprep.subr.bf16.mxu1 %v5221_v53  ;;  %v5258_v53 = vld [vmem:[#allocation7 + $0x7c0] ss:$8 sps:$4 sm:$0xff]  }
 0x240   :  { %2598 = vmatpush2.bf16.msra.mxu0 %v5171_v20 }
 0x241   :  { %2599 = vmatprep.subr.bf16.mxu0 %v5179_v21 }
 0x244   :  { %2600 = vmatpush2.bf16.msra.mxu0 %v5177_v29 }
 0x245   :  { %2601 = vmatprep.subr.bf16.mxu0 %v5185_v30 }
 0x248   :  { %2602 = vmatpush2.bf16.msra.mxu0 %v5183_v34  ;;  %v4627_v34 = vld [vmem:[%s5951_s0 + $0x18] sm:$0xff] }
 0x249   :  { %2603 = vmatprep.subr.bf16.mxu0 %v5191_v36 }
 0x24c   :  { %2604 = vmatpush2.bf16.msra.mxu0 %v5189_v39  ;;  %v5248_v39 = vld [vmem:[#allocation7 + $0x7e4] ss:$8 sps:$4 sm:$0xff]  }
 0x24d   :  { %2605 = vmatprep.subr.bf16.mxu0 %v5197_v40 }
 0x250   :  { %2606 = vmatpush2.bf16.msra.mxu0 %v5195_v42  ;;  %v5246_v42 = vld [vmem:[#allocation7 + $0x7e0] ss:$8 sps:$4 sm:$0xff]  }
 0x251   :  { %4628 = vmatprep.subr.msk.mxu0 %vm150_vm0, %v5839_v28 }
 0x2ab   :  { %v1735_v54 = vpop.f32.mrf.mxu0 }
 0x2ad   :  { %v1737_v55 = vpop.f32.mrf.mxu0 }
 0x2af   :  { %v1739_v59 = vpop.f32.mrf.mxu0 }
 0x2b0   :  { %v5230_v59 = vld [vmem:[#allocation7 + $0x744] ss:$8 sps:$4 sm:$0xff]  }
 0x2b1   :  { %v1776_v61 = vpop.f32.mrf.mxu1  ;;  %v1740_v63 = vpop.f32.mrf.mxu0 }
 0x2b2   :  { %v1777_v3 = vadd.f32 %v1776_v61, %v1735_v54  ;;  %v5266_v54 = vld [vmem:[#allocation7 + $0x7b4] ss:$8 sps:$4 sm:$0xff]   ;;  %v5264_v61 = vld [vmem:[#allocation7 + $0x7b0] ss:$8 sps:$4 sm:$0xff]   ;;  %v5272_v63 = vld [vmem:[#allocation7 + $0x7a4] ss:$8 sps:$4 sm:$0xff]  }
 0x2b3   :  { %v1778_v4 = vpop.f32.mrf.mxu1 }
 0x2b4   :  { %v1779_v5 = vadd.f32 %v1778_v4, %v1737_v55  ;;  %v5225_v55 = vld [vmem:[#allocation7 + $0x750] ss:$8 sps:$4 sm:$0xff]   ;;  %v5233_v4 = vld [vmem:[#allocation7 + $0x734] ss:$8 sps:$4 sm:$0xff]  }
 0x2b5   :  { %v1780_v10 = vpop.f32.mrf.mxu1 }
 0x2b6   :  { %v5278_v10 = vld [vmem:[#allocation7 + $0x794] ss:$8 sps:$4 sm:$0xff]  }
 0x2b7   :  { %v1781_v12 = vpop.f32.mrf.mxu1 }
 0x2b8   :  { %v5231_v12 = vld [vmem:[#allocation7 + $0x730] ss:$8 sps:$4 sm:$0xff]  }
 0x2b9   :  { %v1968_v14 = vpop.f32.mrf.mxu1 }
 0x2ba   :  { %v1969_v15 = vadd.f32 %v1968_v14, %v5734_v33  ;;  %v5236_v14 = vld [vmem:[#allocation7 + $0x724] ss:$8 sps:$4 sm:$0xff]  }
 0x2bb   :  { %v1970_v17 = vpop.f32.mrf.mxu1 }
 0x2bc   :  { %v1971_v19 = vadd.f32 %v1970_v17, %v5737_v35  ;;  %v2045_v20 = vmax.f32 %v1969_v15, 0.0  ;;  %v5276_v15 = vld [vmem:[#allocation7 + $0x790] ss:$8 sps:$4 sm:$0xff]   ;;  %v5284_v17 = vld [vmem:[#allocation7 + $0x784] ss:$8 sps:$4 sm:$0xff]  }
 0x2be   :  { %v2046_v21 = vmax.f32 %v1971_v19, 0.0  ;;  %v2050_v29 = vpack.c.bf16 %v2045_v20, %v2045_v20  ;;  %v5234_v19 = vld [vmem:[#allocation7 + $0x720] ss:$8 sps:$4 sm:$0xff]   ;;  %v5239_v20 = vld [vmem:[#allocation7 + $0x714] ss:$8 sps:$4 sm:$0xff]  }
 0x2bf   :  { %v5855_v22 = vpop.f32.mrf.mxu1 }
 0x2c0   :  { %v2051_v2 = vpack.c.bf16 %v2046_v21, %v2046_v21  ;;  %v5282_v21 = vld [vmem:[#allocation7 + $0x780] ss:$8 sps:$4 sm:$0xff]  }
 0x2c1   :  { %v4852_v30 = vpop.f32.mrf.mxu1 }
 0x2c2   :  { %2607 = vmatprep.mubr.bf16.mxu0 %v2051_v2  ;;  %v2040_v2 = vadd.f32 %v5855_v22, %v5777_v8  ;;  %v5237_v30 = vld [vmem:[#allocation7 + $0x710] ss:$8 sps:$4 sm:$0xff]   ;;  %v5302_v22 = vld [vmem:[#allocation7 + $0x854] ss:$8 sps:$4 sm:$0xff]  }
 0x2c3   :  { %2608 = vmatmul.mubr.bf16.vlgmr.msra.gmra.mxu0 %v2050_v29  ;;  %v5290_v29 = vld [vmem:[#allocation7 + $0x874] ss:$8 sps:$4 sm:$0xff]  }
 0x2c4   :  { %4629 = vmatpush1.msk.msra.mxu0 %vm150_vm0, %v5742_v56  ;;  %2728 = vmatprep.mubr.f32.mxu0 %v5627_v1  ;;  %v116_v56 = vrot.slane %v107_v31, %v5719_v25  ;;  %v5242_v31 = vld [vmem:[#allocation7 + $0x704] ss:$8 sps:$4 sm:$0xff]  }
 0x2c5   :  { %2692 = vmatprep.subr.mxu0 %v5747_v57  ;;  %v991_v57 = vadd.f32 %v5817_v46, %v112_v32  ;;  %v5288_v32 = vld [vmem:[#allocation7 + $0x870] ss:$8 sps:$4 sm:$0xff]  }
 0x2c6   :  { %2693 = vmatpush1.msra.mxu0 %v5750_v58 }
 0x2c7   :  { %2694 = vmatprep.subr.mxu0 %v5753_v60 }
 0x2c8   :  { %2695 = vmatpush1.msra.mxu0 %v5756_v62  ;;  %v992_v62 = vadd.f32 %v5821_v51, %v116_v56  ;;  %v5296_v56 = vld [vmem:[#allocation7 + $0x864] ss:$8 sps:$4 sm:$0xff]  }
 0x2c9   :  { %4631 = vmatprep.subr.msk.mxu0 %vm150_vm0, %v5762_v0 }
 0x2cb   :  { %v1817_v36 = vpop.f32.mrf.mxu0  ;;  %4630 = vmatmul.mubr.msk.f32.vlgmr.msra.gmra.mxu0 %vm146_vm1, %v4627_v34 }
 0x2cc   :  { %v1818_v58 = vadd.f32 %v1817_v36, %v1777_v3  ;;  %4632 = vmatpush1.msk.msra.mxu0 %vm150_vm0, %v5768_v6  ;;  %2799 = vmatprep.mubr.f32.mxu0 %v5627_v1  ;;  %v5228_v3 = vld [vmem:[#allocation7 + $0x740] ss:$8 sps:$4 sm:$0xff]  }
 0x2cd   :  { %2763 = vmatprep.subr.mxu0 %v5773_v7  ;;  %v1819_v60 = vpop.f32.mrf.mxu0  ;;  %v5240_v36 = vld [vmem:[#allocation7 + $0x700] ss:$8 sps:$4 sm:$0xff]  }
 0x2ce   :  { %v5878_v37 = vadd.f32 %v1818_v58, %v991_v57  ;;  %v1820_v0 = vadd.f32 %v1819_v60, %v1779_v5  ;;  %2764 = vmatpush1.msra.mxu0 %v5779_v9  ;;  %v5245_v9 = vld [vmem:[#allocation7 + $0x7f4] ss:$8 sps:$4 sm:$0xff]   ;;  %v5270_v5 = vld [vmem:[#allocation7 + $0x7a0] ss:$8 sps:$4 sm:$0xff]  }
 0x2cf   :  { %2765 = vmatprep.subr.mxu0 %v5782_v11  ;;  %v1821_v38 = vpop.f32.mrf.mxu0  ;;  %v5251_v57 = vld [vmem:[#allocation7 + $0x8f4] ss:$8 sps:$4 sm:$0xff]   ;;  %v5294_v58 = vld [vmem:[#allocation7 + $0x860] ss:$8 sps:$4 sm:$0xff]  }
 0x2d0   :  { %v5882_v46 = vadd.f32 %v1820_v0, %v992_v62  ;;  %2766 = vmatpush1.msra.mxu0 %v5785_v13  ;;  %v5243_v13 = vld [vmem:[#allocation7 + $0x7f0] ss:$8 sps:$4 sm:$0xff]   ;;  %v5257_v0 = vld [vmem:[#allocation7 + $0x8e4] ss:$8 sps:$4 sm:$0xff]  }
 0x2d1   :  { %4633 = vmatmul.mubr.msk.f32.vlgmr.msra.gmra.mxu0 %vm146_vm1, %v4627_v34  ;;  %v1822_v6 = vpop.f32.mrf.mxu0  ;;  %4853 = vmatprep.subr.mxu0 %v5627_v1  ;;  %v5249_v62 = vld [vmem:[#allocation7 + $0x8f0] ss:$8 sps:$4 sm:$0xff]  }
 0x2d2   :  { %4854 = vmatpush3.msk.msra.mxu0 %vm150_vm0, %v5791_v16  ;;  %4859 = vmatprep.mubr.msk.f32.mxu0 %vm5628_vm2, %v5627_v1  ;;  %v5300_v38 = vld [vmem:[#allocation7 + $0x850] ss:$8 sps:$4 sm:$0xff]   ;;  %v5308_v6 = vld [vmem:[#allocation7 + $0x844] ss:$8 sps:$4 sm:$0xff]  }
 0x2d3   :  { %v1897_v7 = vpop.f32.mrf.mxu0  ;;  %4855 = vmatprep.subr.mxu0 %v5627_v1 }
 0x2d4   :  { %v1898_v11 = vadd.f32 %v1897_v7, %v5723_v26  ;;  %4856 = vmatpush3.msra.mxu0 %v5796_v18  ;;  %v5255_v7 = vld [vmem:[#allocation7 + $0x8e0] ss:$8 sps:$4 sm:$0xff]  }
 0x2d5   :  { %v1899_v51 = vpop.f32.mrf.mxu0  ;;  %4857 = vmatprep.subr.mxu0 %v5627_v1 }
 0x2d6   :  { %v2043_v40 = vmax.f32 %v1898_v11, 0.0  ;;  %v1900_v41 = vadd.f32 %v1899_v51, %v5727_v27  ;;  %4858 = vmatpush3.msra.mxu0 %v5802_v24  ;;  %v5222_v24 = vld [vmem:[#allocation7 + $0x760] ss:$8 sps:$4 sm:$0xff]   ;;  %v5269_v51 = vld [vmem:[#allocation7 + $0x8c4] ss:$8 sps:$4 sm:$0xff]  }
 0x2d7   :  { %4860 = vmatmul.mubr.msk.f32.vlgmr.msra.gmra.mxu0 %vm146_vm1, %v4627_v34  ;;  %3367 = vmatprep.subr.bf16.mxu0 %v5245_v9  ;;  %v2047_v34 = vmax.f32 %v2040_v2, 0.0  ;;  %v5263_v9 = vld [vmem:[#allocation7 + $0x8d4] ss:$8 sps:$4 sm:$0xff]   ;;  %v5306_v11 = vld [vmem:[#allocation7 + $0x840] ss:$8 sps:$4 sm:$0xff]  }
 0x2d8   :  { %v2044_v16 = vmax.f32 %v1900_v41, 0.0  ;;  %3368 = vmatpush1.bf16.msra.mxu0 %v5243_v13  ;;  %v2048_v43 = vpack.c.bf16 %v2043_v40, %v2043_v40  ;;  %v5261_v13 = vld [vmem:[#allocation7 + $0x8d0] ss:$8 sps:$4 sm:$0xff]   ;;  %v5267_v41 = vld [vmem:[#allocation7 + $0x8c0] ss:$8 sps:$4 sm:$0xff]  }
 0x2d9   :  { %3369 = vmatprep.subr.bf16.mxu0 %v5248_v39  ;;  %v2052_v60 = vpack.c.bf16 %v2047_v34, %v2047_v34  ;;  %v5314_v39 = vld [vmem:[#allocation7 + $0x834] ss:$8 sps:$4 sm:$0xff]   ;;  %v5312_v40 = vld [vmem:[#allocation7 + $0x830] ss:$8 sps:$4 sm:$0xff]  }
 0x2da   :  { %v2049_v18 = vpack.c.bf16 %v2044_v16, %v2044_v16  ;;  %v5275_v16 = vld [vmem:[#allocation7 + $0x8b4] ss:$8 sps:$4 sm:$0xff]   ;;  %v5333_v2 = vld [vmem:[#allocation7 + $0x910] ss:$8 sps:$4 sm:$0xff]  }
 0x2dc   :  { %2566 = vmatprep.mubr.bf16.mxu1 %v2049_v18  ;;  %3370 = vmatpush1.bf16.msra.mxu0 %v5246_v42  ;;  %v5320_v42 = vld [vmem:[#allocation7 + $0x824] ss:$8 sps:$4 sm:$0xff]  }
 0x2dd   :  { %2567 = vmatmul.mubr.bf16.vlgmr.msra.gmra.mxu1 %v2048_v43  ;;  %3371 = vmatprep.subr.bf16.mxu0 %v5254_v44  ;;  %v5318_v43 = vld [vmem:[#allocation7 + $0x820] ss:$8 sps:$4 sm:$0xff]   ;;  %v5273_v44 = vld [vmem:[#allocation7 + $0x8b0] ss:$8 sps:$4 sm:$0xff]   ;;  %v5281_v18 = vld [vmem:[#allocation7 + $0x8a4] ss:$8 sps:$4 sm:$0xff]  }
 0x2de   :  { %2617 = vmatpush1.bf16.msra.mxu1 %v5219_v45  ;;  %2648 = vmatprep.mubr.bf16.mxu1 %v5629_v48  ;;  %v5326_v45 = vld [vmem:[#allocation7 + $0x814] ss:$8 sps:$4 sm:$0xff]  }
 0x2df   :  { %2618 = vmatprep.subr.bf16.mxu1 %v5224_v47  ;;  %v5324_v47 = vld [vmem:[#allocation7 + $0x810] ss:$8 sps:$4 sm:$0xff]  }
 0x2e0   :  { %3372 = vmatpush1.bf16.msra.mxu0 %v5252_v49  ;;  %v5279_v49 = vld [vmem:[#allocation7 + $0x8a0] ss:$8 sps:$4 sm:$0xff]  }
 0x2e1   :  { %3373 = vmatprep.subr.bf16.mxu0 %v5260_v50  ;;  %v5287_v50 = vld [vmem:[#allocation7 + $0x894] ss:$8 sps:$4 sm:$0xff]  }
 0x2e2   :  { %2619 = vmatpush1.bf16.msra.mxu1 %v5222_v24  ;;  %v5332_v24 = vld [vmem:[#allocation7 + $0x804] ss:$8 sps:$4 sm:$0xff]  }
 0x2e3   :  { %2620 = vmatprep.subr.bf16.mxu1 %v5227_v52  ;;  %v5330_v52 = vld [vmem:[#allocation7 + $0x800] ss:$8 sps:$4 sm:$0xff]  }
 0x2e4   :  { %3374 = vmatpush1.bf16.msra.mxu0 %v5258_v53  ;;  %v5285_v53 = vld [vmem:[#allocation7 + $0x890] ss:$8 sps:$4 sm:$0xff]  }
 0x2e5   :  { %3375 = vmatprep.subr.bf16.mxu0 %v5266_v54  ;;  %v5293_v54 = vld [vmem:[#allocation7 + $0x884] ss:$8 sps:$4 sm:$0xff]  }
 0x2e6   :  { %2621 = vmatpush1.bf16.msra.mxu1 %v5225_v55  ;;  %v5338_v55 = vld [vmem:[#allocation7 + $0x9f4] ss:$8 sps:$4 sm:$0xff]  }
 0x2e7   :  { %2622 = vmatprep.subr.bf16.mxu1 %v5230_v59  ;;  %v5291_v59 = vld [vmem:[#allocation7 + $0x880] ss:$8 sps:$4 sm:$0xff]  }
 0x2e8   :  { %3376 = vmatpush1.bf16.msra.mxu0 %v5264_v61  ;;  %v5299_v61 = vld [vmem:[#allocation7 + $0x974] ss:$8 sps:$4 sm:$0xff]  }
 0x2e9   :  { %3377 = vmatprep.subr.bf16.mxu0 %v5272_v63  ;;  %v5297_v63 = vld [vmem:[#allocation7 + $0x970] ss:$8 sps:$4 sm:$0xff]  }
 0x2ea   :  { %2623 = vmatpush1.bf16.msra.mxu1 %v5228_v3  ;;  %v5305_v3 = vld [vmem:[#allocation7 + $0x964] ss:$8 sps:$4 sm:$0xff]  }
 0x2eb   :  { %2624 = vmatprep.subr.bf16.mxu1 %v5233_v4  ;;  %v5303_v4 = vld [vmem:[#allocation7 + $0x960] ss:$8 sps:$4 sm:$0xff]  }
 0x2ec   :  { %3378 = vmatpush1.bf16.msra.mxu0 %v5270_v5  ;;  %v5311_v5 = vld [vmem:[#allocation7 + $0x954] ss:$8 sps:$4 sm:$0xff]  }
 0x2ed   :  { %3379 = vmatprep.subr.bf16.mxu0 %v5278_v10  ;;  %v5309_v10 = vld [vmem:[#allocation7 + $0x950] ss:$8 sps:$4 sm:$0xff]  }
 0x2ee   :  { %2625 = vmatpush1.bf16.msra.mxu1 %v5231_v12  ;;  %v5317_v12 = vld [vmem:[#allocation7 + $0x944] ss:$8 sps:$4 sm:$0xff]  }
 0x2ef   :  { %2626 = vmatprep.subr.bf16.mxu1 %v5236_v14  ;;  %v5315_v14 = vld [vmem:[#allocation7 + $0x940] ss:$8 sps:$4 sm:$0xff]  }
 0x2f0   :  { %3380 = vmatpush1.bf16.msra.mxu0 %v5276_v15  ;;  %v5323_v15 = vld [vmem:[#allocation7 + $0x934] ss:$8 sps:$4 sm:$0xff]  }
 0x2f1   :  { %3381 = vmatprep.subr.bf16.mxu0 %v5284_v17  ;;  %v5321_v17 = vld [vmem:[#allocation7 + $0x930] ss:$8 sps:$4 sm:$0xff]  }
 0x2f2   :  { %2627 = vmatpush1.bf16.msra.mxu1 %v5234_v19  ;;  %v5329_v19 = vld [vmem:[#allocation7 + $0x924] ss:$8 sps:$4 sm:$0xff]  }
 0x2f3   :  { %2628 = vmatprep.subr.bf16.mxu1 %v5239_v20  ;;  %v5327_v20 = vld [vmem:[#allocation7 + $0x920] ss:$8 sps:$4 sm:$0xff]  }
 0x2f4   :  { %3382 = vmatpush1.bf16.msra.mxu0 %v5282_v21  ;;  %v5335_v21 = vld [vmem:[#allocation7 + $0x914] ss:$8 sps:$4 sm:$0xff]  }
 0x2f5   :  { %3383 = vmatprep.subr.bf16.mxu0 %v5290_v29  ;;  %v5341_v29 = vld [vmem:[#allocation7 + $0x904] ss:$8 sps:$4 sm:$0xff]  }
 0x2f6   :  { %2629 = vmatpush1.bf16.msra.mxu1 %v5237_v30  ;;  %v5339_v30 = vld [vmem:[#allocation7 + $0x900] ss:$8 sps:$4 sm:$0xff]  }
 0x2f7   :  { %2630 = vmatprep.subr.bf16.mxu1 %v5242_v31 }
 0x2f8   :  { %3384 = vmatpush2.bf16.msra.mxu0 %v5288_v32 }
 0x2f9   :  { %3385 = vmatprep.subr.bf16.mxu0 %v5296_v56 }
 0x2fa   :  { %2631 = vmatpush1.bf16.msra.mxu1 %v5240_v36 }
 0x2fb   :  { %3408 = vmatprep.subr.bf16.mxu1 %v5251_v57 }
 0x2fc   :  { %3386 = vmatpush2.bf16.msra.mxu0 %v5294_v58 }
 0x2fd   :  { %2649 = vmatmul.mubr.bf16.vlgmr.msra.gmra.mxu1 %v2052_v60  ;;  %3387 = vmatprep.subr.bf16.mxu0 %v5302_v22 }
 0x2fe   :  { %3409 = vmatpush1.bf16.msra.mxu1 %v5249_v62 }
 0x2ff   :  { %3410 = vmatprep.subr.bf16.mxu1 %v5257_v0 }
 0x300   :  { %3388 = vmatpush2.bf16.msra.mxu0 %v5300_v38 }
 0x301   :  { %3389 = vmatprep.subr.bf16.mxu0 %v5308_v6 }
 0x302   :  { %3411 = vmatpush1.bf16.msra.mxu1 %v5255_v7  ;;  %v5336_v7 = vld [vmem:[#allocation7 + $0x9f0] ss:$8 sps:$4 sm:$0xff]  }
 0x303   :  { %3412 = vmatprep.subr.bf16.mxu1 %v5263_v9 }
 0x304   :  { %3390 = vmatpush2.bf16.msra.mxu0 %v5306_v11 }
 0x305   :  { %3391 = vmatprep.subr.bf16.mxu0 %v5314_v39 }
 0x306   :  { %3413 = vmatpush1.bf16.msra.mxu1 %v5261_v13 }
 0x307   :  { %3414 = vmatprep.subr.bf16.mxu1 %v5269_v51 }
 0x308   :  { %3392 = vmatpush2.bf16.msra.mxu0 %v5312_v40  ;;  %v5342_v40 = vld [vmem:[#allocation7 + $0x9e0] ss:$8 sps:$4 sm:$0xff]  }
 0x309   :  { %3393 = vmatprep.subr.bf16.mxu0 %v5320_v42 }
 0x30a   :  { %3415 = vmatpush1.bf16.msra.mxu1 %v5267_v41  ;;  %v5347_v41 = vld [vmem:[#allocation7 + $0x9d4] ss:$8 sps:$4 sm:$0xff]  }
 0x30b   :  { %3416 = vmatprep.subr.bf16.mxu1 %v5275_v16 }
 0x30c   :  { %3394 = vmatpush2.bf16.msra.mxu0 %v5318_v43 }
 0x30d   :  { %3395 = vmatprep.subr.bf16.mxu0 %v5326_v45  ;;  %v5350_v45 = vld [vmem:[#allocation7 + $0x9c4] ss:$8 sps:$4 sm:$0xff]  }
 0x30e   :  { %3417 = vmatpush1.bf16.msra.mxu1 %v5273_v44 }
 0x30f   :  { %3418 = vmatprep.subr.bf16.mxu1 %v5281_v18  ;;  %v5345_v18 = vld [vmem:[#allocation7 + $0x9d0] ss:$8 sps:$4 sm:$0xff]  }
 0x310   :  { %3396 = vmatpush2.bf16.msra.mxu0 %v5324_v47  ;;  %v5498_v47 = vld [vmem:[#allocation3 + $0x50] sm:$0xf] }
 0x311   :  { %3397 = vmatprep.subr.bf16.mxu0 %v5332_v24 }
 0x312   :  { %3419 = vmatpush1.bf16.msra.mxu1 %v5279_v49  ;;  %v5499_v49 = vld [vmem:[#allocation3 + $0x30] sm:$0xff] }
 0x313   :  { %3420 = vmatprep.subr.bf16.mxu1 %v5287_v50 }
 0x314   :  { %3398 = vmatpush2.bf16.msra.mxu0 %v5330_v52  ;;  %v5500_v52 = vld [vmem:[#allocation3 + $0x28] sm:$0xff] }
 0x315   :  { %3449 = vmatprep.subr.bf16.mxu0 %v5338_v55  ;;  %v5501_v55 = vld [vmem:[#allocation3 + $0x8] sm:$0xff] }
 0x316   :  { %3421 = vmatpush1.bf16.msra.mxu1 %v5285_v53  ;;  %v5348_v53 = vld [vmem:[#allocation7 + $0x9c0] ss:$8 sps:$4 sm:$0xff]  }
 0x317   :  { %3422 = vmatprep.subr.bf16.mxu1 %v5293_v54 }
 0x31a   :  { %3423 = vmatpush1.bf16.msra.mxu1 %v5291_v59  ;;  %v5353_v59 = vld [vmem:[#allocation7 + $0x9b4] ss:$8 sps:$4 sm:$0xff]  }
 0x31b   :  { %3424 = vmatprep.subr.bf16.mxu1 %v5299_v61 }
 0x31e   :  { %3425 = vmatpush2.bf16.msra.mxu1 %v5297_v63  ;;  %v5502_v63 = vld [vmem:[#allocation3] sm:$0xff] }
 0x31f   :  { %3426 = vmatprep.subr.bf16.mxu1 %v5305_v3  ;;  %v4716_v3 = vld [vmem:[%s5951_s0 + $0x20] sm:$0xff] }
 0x322   :  { %3427 = vmatpush2.bf16.msra.mxu1 %v5303_v4  ;;  %v5503_v4 = vld [vmem:[#allocation3 + $0x68] sm:$0xf] }
 0x323   :  { %3428 = vmatprep.subr.bf16.mxu1 %v5311_v5 }
 0x326   :  { %3429 = vmatpush2.bf16.msra.mxu1 %v5309_v10  ;;  %v5351_v10 = vld [vmem:[#allocation7 + $0x9b0] ss:$8 sps:$4 sm:$0xff]  }
 0x327   :  { %3430 = vmatprep.subr.bf16.mxu1 %v5317_v12  ;;  %v5356_v12 = vld [vmem:[#allocation7 + $0x9a4] ss:$8 sps:$4 sm:$0xff]  }
 0x32a   :  { %3431 = vmatpush2.bf16.msra.mxu1 %v5315_v14 }
 0x32b   :  { %3432 = vmatprep.subr.bf16.mxu1 %v5323_v15  ;;  %v5504_v15 = vld [vmem:[#allocation3 + $0x60] sm:$0xf] }
 0x32e   :  { %3433 = vmatpush2.bf16.msra.mxu1 %v5321_v17  ;;  %v5505_v17 = vld [vmem:[#allocation3 + $0x40] sm:$0xff] }
 0x32f   :  { %3434 = vmatprep.subr.bf16.mxu1 %v5329_v19  ;;  %v5506_v19 = vld [vmem:[#allocation3 + $0x38] sm:$0xff] }
 0x332   :  { %3435 = vmatpush2.bf16.msra.mxu1 %v5327_v20  ;;  %v5354_v20 = vld [vmem:[#allocation7 + $0x9a0] ss:$8 sps:$4 sm:$0xff]  }
 0x333   :  { %3436 = vmatprep.subr.bf16.mxu1 %v5335_v21  ;;  %v5507_v21 = vld [vmem:[#allocation3 + $0x18] sm:$0xff] }
 0x336   :  { %3437 = vmatpush2.bf16.msra.mxu1 %v5333_v2  ;;  %v5359_v2 = vld [vmem:[#allocation7 + $0x994] ss:$8 sps:$4 sm:$0xff]  }
 0x337   :  { %3438 = vmatprep.subr.bf16.mxu1 %v5341_v29  ;;  %v5508_v29 = vld [vmem:[#allocation3 + $0x10] sm:$0xff] }
 0x33a   :  { %3439 = vmatpush2.bf16.msra.mxu1 %v5339_v30 }
 0x33b   :  { %4717 = vmatprep.subr.msk.mxu1 %vm150_vm0, %v5839_v28  ;;  %v5344_v28 = vld [vmem:[#allocation7 + $0x9e4] ss:$8 sps:$4 sm:$0xff]  }
 0x383   :  { %v2609_v31 = vpop.f32.mrf.mxu0 }
 0x385   :  { %v2611_v32 = vpop.f32.mrf.mxu0 }
 0x387   :  { %v2613_v34 = vpop.f32.mrf.mxu0 }
 0x388   :  { %v5362_v34 = vld [vmem:[#allocation7 + $0x984] ss:$8 sps:$4 sm:$0xff]  }
 0x389   :  { %v2614_v56 = vpop.f32.mrf.mxu0 }
 0x38a   :  { %v5510_v56 = vld [vmem:[#allocation3 + $0x48] sm:$0xff] }
 0x38b   :  { %v2730_v36 = vpop.f32.mrf.mxu0 }
 0x38c   :  { %v2731_v57 = vadd.f32 %v2730_v36, %v5723_v26  ;;  %v5365_v36 = vld [vmem:[#allocation7 + $0xa74] ss:$8 sps:$4 sm:$0xff]  }
 0x38d   :  { %v2732_v58 = vpop.f32.mrf.mxu0 }
 0x38e   :  { %v2733_v60 = vadd.f32 %v2732_v58, %v5727_v27  ;;  %v2876_v22 = vmax.f32 %v2731_v57, 0.0  ;;  %v5363_v58 = vld [vmem:[#allocation7 + $0xa70] ss:$8 sps:$4 sm:$0xff]  }
 0x390   :  { %v2877_v62 = vmax.f32 %v2733_v60, 0.0  ;;  %v2881_v9 = vpack.c.bf16 %v2876_v22, %v2876_v22  ;;  %v5360_v60 = vld [vmem:[#allocation7 + $0x980] ss:$8 sps:$4 sm:$0xff]  }
 0x391   :  { %v2801_v0 = vpop.f32.mrf.mxu0  ;;  %v5511_v22 = vld [vmem:[#allocation3 + $0x20] sm:$0xff] }
 0x392   :  { %v2882_v38 = vpack.c.bf16 %v2877_v62, %v2877_v62  ;;  %v2802_v6 = vadd.f32 %v2801_v0, %v5734_v33  ;;  %v5368_v62 = vld [vmem:[#allocation7 + $0xa64] ss:$8 sps:$4 sm:$0xff]   ;;  %v5371_v0 = vld [vmem:[#allocation7 + $0xb74] ss:$8 sps:$4 sm:$0xff]  }
 0x393   :  { %v2803_v11 = vpop.f32.mrf.mxu0 }
 0x394   :  { %v2804_v13 = vadd.f32 %v2803_v11, %v5737_v35  ;;  %3399 = vmatprep.mubr.bf16.mxu0 %v2882_v38  ;;  %v2878_v51 = vmax.f32 %v2802_v6, 0.0  ;;  %v5366_v6 = vld [vmem:[#allocation7 + $0xa60] ss:$8 sps:$4 sm:$0xff]   ;;  %v5372_v11 = vld [vmem:[#allocation7 + $0xa50] ss:$8 sps:$4 sm:$0xff]  }
 0x395   :  { %3400 = vmatmul.mubr.bf16.vlgmr.msra.gmra.mxu0 %v2881_v9  ;;  %v5374_v9 = vld [vmem:[#allocation7 + $0xa54] ss:$8 sps:$4 sm:$0xff]  }
 0x396   :  { %v2879_v39 = vmax.f32 %v2804_v13, 0.0  ;;  %3450 = vmatpush1.bf16.msra.mxu0 %v5336_v7  ;;  %3481 = vmatprep.mubr.bf16.mxu0 %v5629_v48  ;;  %v2883_v43 = vpack.c.bf16 %v2878_v51, %v2878_v51  ;;  %v5369_v7 = vld [vmem:[#allocation7 + $0xb70] ss:$8 sps:$4 sm:$0xff]   ;;  %v5380_v13 = vld [vmem:[#allocation7 + $0xa44] ss:$8 sps:$4 sm:$0xff]  }
 0x397   :  { %3451 = vmatprep.subr.bf16.mxu0 %v5344_v28  ;;  %v2872_v16 = vpop.f32.mrf.mxu0  ;;  %v5375_v28 = vld [vmem:[#allocation7 + $0xb60] ss:$8 sps:$4 sm:$0xff]   ;;  %v5383_v51 = vld [vmem:[#allocation7 + $0xb54] ss:$8 sps:$4 sm:$0xff]  }
 0x398   :  { %v2884_v42 = vpack.c.bf16 %v2879_v39, %v2879_v39  ;;  %v2873_v30 = vadd.f32 %v2872_v16, %v5777_v8  ;;  %v5378_v39 = vld [vmem:[#allocation7 + $0xa40] ss:$8 sps:$4 sm:$0xff]   ;;  %v5389_v16 = vld [vmem:[#allocation7 + $0xb44] ss:$8 sps:$4 sm:$0xff]  }
 0x399   :  { %v4861_v44 = vpop.f32.mrf.mxu0 }
 0x39a   :  { %3440 = vmatprep.mubr.bf16.mxu1 %v2884_v42  ;;  %3452 = vmatpush1.bf16.msra.mxu0 %v5342_v40  ;;  %v2880_v57 = vmax.f32 %v2873_v30, 0.0  ;;  %v5381_v40 = vld [vmem:[#allocation7 + $0xb50] ss:$8 sps:$4 sm:$0xff]  }
 0x39b   :  { %3441 = vmatmul.mubr.bf16.vlgmr.msra.gmra.mxu1 %v2883_v43  ;;  %3453 = vmatprep.subr.bf16.mxu0 %v5347_v41  ;;  %v5386_v41 = vld [vmem:[#allocation7 + $0xa34] ss:$8 sps:$4 sm:$0xff]   ;;  %v5384_v43 = vld [vmem:[#allocation7 + $0xa30] ss:$8 sps:$4 sm:$0xff]  }
 0x39c   :  { %4718 = vmatpush1.msk.msra.mxu1 %vm150_vm0, %v5498_v47  ;;  %3561 = vmatprep.mubr.f32.mxu1 %v5627_v1  ;;  %v2885_v38 = vpack.c.bf16 %v2880_v57, %v2880_v57  ;;  %v5420_v30 = vld [vmem:[#allocation7 + $0xad0] ss:$8 sps:$4 sm:$0xff]  }
 0x39d   :  { %3525 = vmatprep.subr.mxu1 %v5499_v49  ;;  %v2568_v50 = vpop.f32.mrf.mxu1  ;;  %v5395_v49 = vld [vmem:[#allocation7 + $0xb34] ss:$8 sps:$4 sm:$0xff]   ;;  %v5429_v57 = vld [vmem:[#allocation7 + $0xbd0] ss:$8 sps:$4 sm:$0xff]  }
 0x39e   :  { %v5910_v24 = vadd.f32 %v2609_v31, %v2568_v50  ;;  %3454 = vmatpush1.bf16.msra.mxu0 %v5345_v18  ;;  %3526 = vmatpush1.msra.mxu1 %v5500_v52  ;;  %v5357_v31 = vld [vmem:[#allocation7 + $0x990] ss:$8 sps:$4 sm:$0xff]   ;;  %v5387_v18 = vld [vmem:[#allocation7 + $0xb40] ss:$8 sps:$4 sm:$0xff]  }
 0x39f   :  { %v2570_v54 = vpop.f32.mrf.mxu1  ;;  %3527 = vmatprep.subr.mxu1 %v5501_v55  ;;  %3455 = vmatprep.subr.bf16.mxu0 %v5350_v45  ;;  %v5392_v45 = vld [vmem:[#allocation7 + $0xa24] ss:$8 sps:$4 sm:$0xff]  }
 0x3a0   :  { %v5912_v61 = vadd.f32 %v2611_v32, %v2570_v54  ;;  %3528 = vmatpush1.msra.mxu1 %v5502_v63  ;;  %v5509_v32 = vld [vmem:[#allocation3 + $0x70] sm:$0xf]  ;;  %v5390_v54 = vld [vmem:[#allocation7 + $0xa20] ss:$8 sps:$4 sm:$0xff]  }
 0x3a1   :  { %4720 = vmatprep.subr.msk.mxu1 %vm150_vm0, %v5503_v4  ;;  %v2572_v5 = vpop.f32.mrf.mxu1  ;;  %v5396_v4 = vld [vmem:[#allocation7 + $0xa10] ss:$8 sps:$4 sm:$0xff]  }
 0x3a2   :  { %3456 = vmatpush1.bf16.msra.mxu0 %v5348_v53  ;;  %v5404_v5 = vld [vmem:[#allocation7 + $0xa04] ss:$8 sps:$4 sm:$0xff]  }
 0x3a3   :  { %4719 = vmatmul.mubr.msk.f32.vlgmr.msra.gmra.mxu1 %vm146_vm1, %v4716_v3  ;;  %3457 = vmatprep.subr.bf16.mxu0 %v5353_v59  ;;  %v2573_v14 = vpop.f32.mrf.mxu1  ;;  %v5398_v59 = vld [vmem:[#allocation7 + $0xa14] ss:$8 sps:$4 sm:$0xff]  }
 0x3a4   :  { %4721 = vmatpush1.msk.msra.mxu1 %vm150_vm0, %v5504_v15  ;;  %3632 = vmatprep.mubr.f32.mxu1 %v5627_v1  ;;  %v5413_v14 = vld [vmem:[#allocation7 + $0xb04] ss:$8 sps:$4 sm:$0xff]   ;;  %v5408_v15 = vld [vmem:[#allocation7 + $0xaf0] ss:$8 sps:$4 sm:$0xff]  }
 0x3a5   :  { %3596 = vmatprep.subr.mxu1 %v5505_v17  ;;  %v5411_v17 = vld [vmem:[#allocation7 + $0xb00] ss:$8 sps:$4 sm:$0xff]  }
 0x3a6   :  { %3597 = vmatpush1.msra.mxu1 %v5506_v19  ;;  %3458 = vmatpush1.bf16.msra.mxu0 %v5351_v10  ;;  %v5402_v10 = vld [vmem:[#allocation7 + $0xa00] ss:$8 sps:$4 sm:$0xff]   ;;  %v5416_v19 = vld [vmem:[#allocation7 + $0xae4] ss:$8 sps:$4 sm:$0xff]  }
 0x3a7   :  { %3598 = vmatprep.subr.mxu1 %v5507_v21  ;;  %3459 = vmatprep.subr.bf16.mxu0 %v5356_v12  ;;  %v5410_v12 = vld [vmem:[#allocation7 + $0xaf4] ss:$8 sps:$4 sm:$0xff]   ;;  %v5414_v21 = vld [vmem:[#allocation7 + $0xae0] ss:$8 sps:$4 sm:$0xff]  }
 0x3a8   :  { %3599 = vmatpush1.msra.mxu1 %v5508_v29  ;;  %v5422_v29 = vld [vmem:[#allocation7 + $0xad4] ss:$8 sps:$4 sm:$0xff]  }
 0x3a9   :  { %4722 = vmatmul.mubr.msk.f32.vlgmr.msra.gmra.mxu1 %vm146_vm1, %v4716_v3  ;;  %4862 = vmatprep.subr.mxu1 %v5627_v1 }
 0x3aa   :  { %3460 = vmatpush1.bf16.msra.mxu0 %v5354_v20  ;;  %4863 = vmatpush3.msk.msra.mxu1 %vm150_vm0, %v5509_v32  ;;  %v5419_v20 = vld [vmem:[#allocation7 + $0xbf4] ss:$8 sps:$4 sm:$0xff]   ;;  %v5423_v32 = vld [vmem:[#allocation7 + $0xbe0] ss:$8 sps:$4 sm:$0xff]  }
 0x3ab   :  { %3461 = vmatprep.subr.bf16.mxu0 %v5359_v2  ;;  %4864 = vmatprep.subr.mxu1 %v5627_v1  ;;  %v5417_v2 = vld [vmem:[#allocation7 + $0xbf0] ss:$8 sps:$4 sm:$0xff]  }
 0x3ac   :  { %4865 = vmatpush3.msra.mxu1 %v5510_v56  ;;  %4868 = vmatprep.mubr.msk.f32.mxu1 %vm5628_vm2, %v5627_v1  ;;  %v5426_v56 = vld [vmem:[#allocation7 + $0xac0] ss:$8 sps:$4 sm:$0xff]  }
 0x3ad   :  { %4866 = vmatprep.subr.mxu1 %v5627_v1  ;;  %v5377_v1 = vld [vmem:[#allocation7 + $0xb64] ss:$8 sps:$4 sm:$0xff]  }
 0x3ae   :  { %3462 = vmatpush1.bf16.msra.mxu0 %v5357_v31  ;;  %4867 = vmatpush3.msra.mxu1 %v5511_v22  ;;  %v5425_v31 = vld [vmem:[#allocation7 + $0xbe4] ss:$8 sps:$4 sm:$0xff]  }
 0x3af   :  { %3463 = vmatprep.subr.bf16.mxu0 %v5362_v34  ;;  %4869 = vmatmul.mubr.msk.f32.vlgmr.msra.gmra.mxu1 %vm146_vm1, %v4716_v3  ;;  %v5401_v3 = vld [vmem:[#allocation7 + $0xb24] ss:$8 sps:$4 sm:$0xff]  }
 0x3b0   :  { %4200 = vmatprep.subr.bf16.mxu1 %v5365_v36  ;;  %v5428_v34 = vld [vmem:[#allocation7 + $0xac4] ss:$8 sps:$4 sm:$0xff]   ;;  %v5431_v36 = vld [vmem:[#allocation7 + $0xbd4] ss:$8 sps:$4 sm:$0xff]  }
 0x3b1   :  { %4201 = vmatpush1.bf16.msra.mxu1 %v5363_v58  ;;  %v5434_v58 = vld [vmem:[#allocation7 + $0xab4] ss:$8 sps:$4 sm:$0xff]   ;;  %v5437_v22 = vld [vmem:[#allocation7 + $0xbc4] ss:$8 sps:$4 sm:$0xff]  }
 0x3b2   :  { %3464 = vmatpush1.bf16.msra.mxu0 %v5360_v60  ;;  %4202 = vmatprep.subr.bf16.mxu1 %v5368_v62  ;;  %v5432_v60 = vld [vmem:[#allocation7 + $0xab0] ss:$8 sps:$4 sm:$0xff]   ;;  %v5435_v62 = vld [vmem:[#allocation7 + $0xbc0] ss:$8 sps:$4 sm:$0xff]  }
 0x3b3   :  { %4241 = vmatprep.subr.bf16.mxu0 %v5371_v0  ;;  %v5440_v0 = vld [vmem:[#allocation7 + $0xaa4] ss:$8 sps:$4 sm:$0xff]  }
 0x3b5   :  { %3482 = vmatmul.mubr.bf16.vlgmr.msra.gmra.mxu0 %v2885_v38  ;;  %4203 = vmatpush1.bf16.msra.mxu1 %v5366_v6  ;;  %v5438_v38 = vld [vmem:[#allocation7 + $0xaa0] ss:$8 sps:$4 sm:$0xff]   ;;  %v5443_v6 = vld [vmem:[#allocation7 + $0xbb4] ss:$8 sps:$4 sm:$0xff]  }
 0x3b6   :  { %4242 = vmatpush1.bf16.msra.mxu0 %v5369_v7  ;;  %4204 = vmatprep.subr.bf16.mxu1 %v5374_v9  ;;  %v5441_v7 = vld [vmem:[#allocation7 + $0xbb0] ss:$8 sps:$4 sm:$0xff]   ;;  %v5446_v9 = vld [vmem:[#allocation7 + $0xa94] ss:$8 sps:$4 sm:$0xff]  }
 0x3b7   :  { %4243 = vmatprep.subr.bf16.mxu0 %v5377_v1  ;;  %v5444_v1 = vld [vmem:[#allocation7 + $0xa90] ss:$8 sps:$4 sm:$0xff]  }
 0x3b9   :  { %4205 = vmatpush1.bf16.msra.mxu1 %v5372_v11  ;;  %v5449_v11 = vld [vmem:[#allocation7 + $0xba4] ss:$8 sps:$4 sm:$0xff]  }
 0x3ba   :  { %4244 = vmatpush1.bf16.msra.mxu0 %v5375_v28  ;;  %4206 = vmatprep.subr.bf16.mxu1 %v5380_v13  ;;  %v5447_v28 = vld [vmem:[#allocation7 + $0xba0] ss:$8 sps:$4 sm:$0xff]   ;;  %v5452_v13 = vld [vmem:[#allocation7 + $0xa84] ss:$8 sps:$4 sm:$0xff]  }
 0x3bb   :  { %4245 = vmatprep.subr.bf16.mxu0 %v5383_v51  ;;  %v5450_v51 = vld [vmem:[#allocation7 + $0xa80] ss:$8 sps:$4 sm:$0xff]  }
 0x3bd   :  { %v2650_v42 = vpop.f32.mrf.mxu1  ;;  %4207 = vmatpush1.bf16.msra.mxu1 %v5378_v39  ;;  %v5455_v39 = vld [vmem:[#allocation7 + $0xb94] ss:$8 sps:$4 sm:$0xff]  }
 0x3be   :  { %v2651_v44 = vadd.f32 %v2650_v42, %v5910_v24  ;;  %4246 = vmatpush1.bf16.msra.mxu0 %v5381_v40  ;;  %4208 = vmatprep.subr.bf16.mxu1 %v5386_v41  ;;  %v5393_v24 = vld [vmem:[#allocation7 + $0xb30] ss:$8 sps:$4 sm:$0xff]   ;;  %v5458_v41 = vld [vmem:[#allocation7 + $0xc74] ss:$8 sps:$4 sm:$0xff]   ;;  %v5459_v42 = vld [vmem:[#allocation7 + $0xb80] ss:$8 sps:$4 sm:$0xff]  }
 0x3bf   :  { %v2652_v47 = vpop.f32.mrf.mxu1  ;;  %4247 = vmatprep.subr.bf16.mxu0 %v5389_v16  ;;  %v5453_v40 = vld [vmem:[#allocation7 + $0xb90] ss:$8 sps:$4 sm:$0xff]   ;;  %v5461_v16 = vld [vmem:[#allocation7 + $0xb84] ss:$8 sps:$4 sm:$0xff]  }
 0x3c0   :  { %v5932_v50 = vadd.f32 %v2651_v44, %v5878_v37  ;;  %v2653_v52 = vadd.f32 %v2652_v47, %v5912_v61  ;;  %v5399_v37 = vld [vmem:[#allocation7 + $0xb20] ss:$8 sps:$4 sm:$0xff]   ;;  %v5407_v61 = vld [vmem:[#allocation7 + $0xb14] ss:$8 sps:$4 sm:$0xff]  }
 0x3c1   :  { %v2654_v53 = vpop.f32.mrf.mxu1  ;;  %4209 = vmatpush1.bf16.msra.mxu1 %v5384_v43 }
 0x3c2   :  { %v5936_v55 = vadd.f32 %v2653_v52, %v5882_v46  ;;  %4248 = vmatpush1.bf16.msra.mxu0 %v5387_v18  ;;  %4210 = vmatprep.subr.bf16.mxu1 %v5392_v45  ;;  %v5405_v46 = vld [vmem:[#allocation7 + $0xb10] ss:$8 sps:$4 sm:$0xff]  }
 0x3c3   :  { %v2655_v63 = vpop.f32.mrf.mxu1  ;;  %4249 = vmatprep.subr.bf16.mxu0 %v5395_v49 }
 0x3c5   :  { %4211 = vmatpush1.bf16.msra.mxu1 %v5390_v54 }
 0x3c6   :  { %4250 = vmatpush1.bf16.msra.mxu0 %v5393_v24  ;;  %4212 = vmatprep.subr.bf16.mxu1 %v5398_v59 }
 0x3c7   :  { %4251 = vmatprep.subr.bf16.mxu0 %v5401_v3 }
 0x3c9   :  { %4213 = vmatpush1.bf16.msra.mxu1 %v5396_v4 }
 0x3ca   :  { %4252 = vmatpush1.bf16.msra.mxu0 %v5399_v37  ;;  %4214 = vmatprep.subr.bf16.mxu1 %v5404_v5 }
 0x3cb   :  { %4253 = vmatprep.subr.bf16.mxu0 %v5407_v61 }
 0x3cd   :  { %4215 = vmatpush1.bf16.msra.mxu1 %v5402_v10 }
 0x3ce   :  { %4254 = vmatpush1.bf16.msra.mxu0 %v5405_v46  ;;  %4216 = vmatprep.subr.bf16.mxu1 %v5410_v12  ;;  %v5456_v12 = vld [vmem:[#allocation7 + $0xc70] ss:$8 sps:$4 sm:$0xff]  }
 0x3cf   :  { %4255 = vmatprep.subr.bf16.mxu0 %v5413_v14 }
 0x3d1   :  { %4217 = vmatpush2.bf16.msra.mxu1 %v5408_v15 }
 0x3d2   :  { %4256 = vmatpush1.bf16.msra.mxu0 %v5411_v17  ;;  %4218 = vmatprep.subr.bf16.mxu1 %v5416_v19  ;;  %v5464_v17 = vld [vmem:[#allocation7 + $0xc64] ss:$8 sps:$4 sm:$0xff]  }
 0x3d3   :  { %4257 = vmatprep.subr.bf16.mxu0 %v5419_v20 }
 0x3d5   :  { %4219 = vmatpush2.bf16.msra.mxu1 %v5414_v21 }
 0x3d6   :  { %4258 = vmatpush2.bf16.msra.mxu0 %v5417_v2  ;;  %4220 = vmatprep.subr.bf16.mxu1 %v5422_v29  ;;  %v5467_v2 = vld [vmem:[#allocation7 + $0xc54] ss:$8 sps:$4 sm:$0xff]  }
 0x3d7   :  { %4259 = vmatprep.subr.bf16.mxu0 %v5425_v31  ;;  %v5465_v31 = vld [vmem:[#allocation7 + $0xc50] ss:$8 sps:$4 sm:$0xff]  }
 0x3d9   :  { %4221 = vmatpush2.bf16.msra.mxu1 %v5420_v30 }
 0x3da   :  { %4260 = vmatpush2.bf16.msra.mxu0 %v5423_v32  ;;  %4222 = vmatprep.subr.bf16.mxu1 %v5428_v34  ;;  %v5470_v32 = vld [vmem:[#allocation7 + $0xc44] ss:$8 sps:$4 sm:$0xff]  }
 0x3db   :  { %4261 = vmatprep.subr.bf16.mxu0 %v5431_v36 }
 0x3dd   :  { %4223 = vmatpush2.bf16.msra.mxu1 %v5426_v56  ;;  %v5468_v56 = vld [vmem:[#allocation7 + $0xc40] ss:$8 sps:$4 sm:$0xff]  }
 0x3de   :  { %4262 = vmatpush2.bf16.msra.mxu0 %v5429_v57  ;;  %4224 = vmatprep.subr.bf16.mxu1 %v5434_v58  ;;  %v5473_v57 = vld [vmem:[#allocation7 + $0xc34] ss:$8 sps:$4 sm:$0xff]  }
 0x3df   :  { %4263 = vmatprep.subr.bf16.mxu0 %v5437_v22 }
 0x3e1   :  { %4225 = vmatpush2.bf16.msra.mxu1 %v5432_v60 }
 0x3e2   :  { %4264 = vmatpush2.bf16.msra.mxu0 %v5435_v62  ;;  %4226 = vmatprep.subr.bf16.mxu1 %v5440_v0  ;;  %v5471_v62 = vld [vmem:[#allocation7 + $0xc30] ss:$8 sps:$4 sm:$0xff]   ;;  %v5476_v0 = vld [vmem:[#allocation7 + $0xc24] ss:$8 sps:$4 sm:$0xff]  }
 0x3e3   :  { %4265 = vmatprep.subr.bf16.mxu0 %v5443_v6  ;;  %v5474_v6 = vld [vmem:[#allocation7 + $0xc20] ss:$8 sps:$4 sm:$0xff]  }
 0x3e5   :  { %4227 = vmatpush2.bf16.msra.mxu1 %v5438_v38 }
 0x3e6   :  { %4266 = vmatpush2.bf16.msra.mxu0 %v5441_v7  ;;  %4228 = vmatprep.subr.bf16.mxu1 %v5446_v9  ;;  %v5479_v7 = vld [vmem:[#allocation7 + $0xc14] ss:$8 sps:$4 sm:$0xff]  }
 0x3e7   :  { %4267 = vmatprep.subr.bf16.mxu0 %v5449_v11  ;;  %v5482_v11 = vld [vmem:[#allocation7 + $0xc04] ss:$8 sps:$4 sm:$0xff]  }
 0x3e9   :  { %4229 = vmatpush2.bf16.msra.mxu1 %v5444_v1  ;;  %v5477_v1 = vld [vmem:[#allocation7 + $0xc10] ss:$8 sps:$4 sm:$0xff]  }
 0x3ea   :  { %4268 = vmatpush2.bf16.msra.mxu0 %v5447_v28  ;;  %4230 = vmatprep.subr.bf16.mxu1 %v5452_v13  ;;  %v5480_v28 = vld [vmem:[#allocation7 + $0xc00] ss:$8 sps:$4 sm:$0xff]  }
 0x3eb   :  { %4269 = vmatprep.subr.bf16.mxu0 %v5455_v39 }
 0x3ed   :  { %4231 = vmatpush2.bf16.msra.mxu1 %v5450_v51 }
 0x3ee   :  { %4270 = vmatpush2.bf16.msra.mxu0 %v5453_v40  ;;  %4282 = vmatprep.subr.bf16.mxu1 %v5458_v41 }
 0x3ef   :  { %4271 = vmatprep.subr.bf16.mxu0 %v5461_v16 }
 0x3f2   :  { %4272 = vmatpush2.bf16.msra.mxu0 %v5459_v42 }
 0x455   :  { %v3401_v43 = vpop.f32.mrf.mxu0 }
 0x457   :  { %v3403_v44 = vpop.f32.mrf.mxu0 }
 0x459   :  { %v3405_v18 = vpop.f32.mrf.mxu0 }
 0x45b   :  { %v3442_v45 = vpop.f32.mrf.mxu1  ;;  %v3406_v47 = vpop.f32.mrf.mxu0 }
 0x45c   :  { %v3443_v49 = vadd.f32 %v3442_v45, %v3401_v43 }
 0x45d   :  { %v3444_v52 = vpop.f32.mrf.mxu1 }
 0x45e   :  { %v3445_v53 = vadd.f32 %v3444_v52, %v3403_v44 }
 0x45f   :  { %v3446_v54 = vpop.f32.mrf.mxu1 }
 0x461   :  { %v3447_v24 = vpop.f32.mrf.mxu1 }
 0x463   :  { %v3563_v59 = vpop.f32.mrf.mxu1 }
 0x464   :  { %v3564_v63 = vadd.f32 %v3563_v59, %v5723_v26  ;;  %v5462_v26 = vld [vmem:[#allocation7 + $0xc60] ss:$8 sps:$4 sm:$0xff]  }
 0x465   :  { %v3565_v3 = vpop.f32.mrf.mxu1 }
 0x466   :  { %v3566_v4 = vadd.f32 %v3565_v3, %v5727_v27  ;;  %v3709_v37 = vmax.f32 %v3564_v63, 0.0 }
 0x468   :  { %v3710_v5 = vmax.f32 %v3566_v4, 0.0  ;;  %v3714_v14 = vpack.c.bf16 %v3709_v37, %v3709_v37 }
 0x469   :  { %v3634_v61 = vpop.f32.mrf.mxu1 }
 0x46a   :  { %v3715_v10 = vpack.c.bf16 %v3710_v5, %v3710_v5  ;;  %v3635_v46 = vadd.f32 %v3634_v61, %v5734_v33 }
 0x46b   :  { %v3636_v15 = vpop.f32.mrf.mxu1 }
 0x46c   :  { %v3711_v19 = vmax.f32 %v3635_v46, 0.0  ;;  %v3637_v20 = vadd.f32 %v3636_v15, %v5737_v35  ;;  %4232 = vmatprep.mubr.bf16.mxu1 %v3715_v10  ;;  %v4805_v46 = vld [vmem:[#allocation2] ss:$0 sm:$0xff] }
 0x46d   :  { %4233 = vmatmul.mubr.bf16.vlgmr.msra.gmra.mxu1 %v3714_v14 }
 0x46e   :  { %v3712_v21 = vmax.f32 %v3637_v20, 0.0  ;;  %4283 = vmatpush1.bf16.msra.mxu1 %v5456_v12  ;;  %4314 = vmatprep.mubr.bf16.mxu1 %v5629_v48  ;;  %v3716_v27 = vpack.c.bf16 %v3711_v19, %v3711_v19 }
 0x46f   :  { %4284 = vmatprep.subr.bf16.mxu1 %v5464_v17  ;;  %v3705_v29 = vpop.f32.mrf.mxu1 }
 0x470   :  { %v3717_v30 = vpack.c.bf16 %v3712_v21, %v3712_v21  ;;  %v3706_v9 = vadd.f32 %v3705_v29, %v5777_v8 }
 0x471   :  { %v4870_v33 = vpop.f32.mrf.mxu1 }
 0x472   :  { %4273 = vmatprep.mubr.bf16.mxu0 %v3717_v30  ;;  %4285 = vmatpush1.bf16.msra.mxu1 %v5462_v26 }
 0x473   :  { %4274 = vmatmul.mubr.bf16.vlgmr.msra.gmra.mxu0 %v3716_v27  ;;  %4286 = vmatprep.subr.bf16.mxu1 %v5467_v2 }
 0x475   :  { %v3483_v35 = vpop.f32.mrf.mxu0 }
 0x476   :  { %v3484_v34 = vadd.f32 %v3483_v35, %v3443_v49  ;;  %4287 = vmatpush1.bf16.msra.mxu1 %v5465_v31  ;;  %v4327_v49 = vld [vmem:[#allocation10] sm:$0x3] }
 0x477   :  { %v3485_v36 = vpop.f32.mrf.mxu0  ;;  %4288 = vmatprep.subr.bf16.mxu1 %v5470_v32  ;;  %v4332_v63 = vrot.slane %v4327_v49, %v5714_v23  ;;  %v4336_v3 = vrot.slane %v4327_v49, %v5719_v25 }
 0x478   :  { %v3490_v48 = vadd.f32 %v3484_v34, %v5932_v50  ;;  %v3486_v58 = vadd.f32 %v3485_v36, %v3445_v53  ;;  %v3713_v50 = vmax.f32 %v3706_v9, 0.0 }
 0x479   :  { %v3487_v60 = vpop.f32.mrf.mxu0 }
 0x47a   :  { %v3491_v22 = vadd.f32 %v3486_v58, %v5936_v55  ;;  %4289 = vmatpush1.bf16.msra.mxu1 %v5468_v56  ;;  %v3718_v55 = vpack.c.bf16 %v3713_v50, %v3713_v50 }
 0x47b   :  { %4290 = vmatprep.subr.bf16.mxu1 %v5473_v57  ;;  %v3488_v38 = vpop.f32.mrf.mxu0 }
 0x47e   :  { %4291 = vmatpush1.bf16.msra.mxu1 %v5471_v62 }
 0x47f   :  { %4292 = vmatprep.subr.bf16.mxu1 %v5476_v0 }
 0x482   :  { %4293 = vmatpush1.bf16.msra.mxu1 %v5474_v6 }
 0x483   :  { %4294 = vmatprep.subr.bf16.mxu1 %v5479_v7 }
 0x486   :  { %4295 = vmatpush1.bf16.msra.mxu1 %v5477_v1 }
 0x487   :  { %4296 = vmatprep.subr.bf16.mxu1 %v5482_v11 }
 0x48a   :  { %4297 = vmatpush1.bf16.msra.mxu1 %v5480_v28 }
 0x48d   :  { %4315 = vmatmul.mubr.bf16.vlgmr.msra.gmra.mxu1 %v3718_v55 }
 0x52d   :  { %v4234_v13 = vpop.f32.mrf.mxu1 }
 0x52f   :  { %v4236_v51 = vpop.f32.mrf.mxu1 }
 0x531   :  { %v4238_v39 = vpop.f32.mrf.mxu1 }
 0x533   :  { %v4275_v40 = vpop.f32.mrf.mxu0  ;;  %v4239_v41 = vpop.f32.mrf.mxu1 }
 0x534   :  { %v4276_v8 = vadd.f32 %v4275_v40, %v4234_v13 }
 0x535   :  { %v4277_v16 = vpop.f32.mrf.mxu0 }
 0x536   :  { %v4278_v18 = vadd.f32 %v4277_v16, %v4236_v51 }
 0x537   :  { %v4279_v42 = vpop.f32.mrf.mxu0 }
 0x539   :  { %v4280_v43 = vpop.f32.mrf.mxu0 }
 0x54d   :  { %v4316_v44 = vpop.f32.mrf.mxu1 }
 0x54e   :  { %v4317_v45 = vadd.f32 %v4316_v44, %v4276_v8 }
 0x54f   :  { %v4318_v47 = vpop.f32.mrf.mxu1 }
 0x550   :  { %v4323_v52 = vadd.f32 %v4317_v45, %v3490_v48  ;;  %v4319_v53 = vadd.f32 %v4318_v47, %v4278_v18 }
 0x551   :  { %v4320_v54 = vpop.f32.mrf.mxu1 }
 0x552   :  { %v4325_v24 = vmax.f32 %v4323_v52, 0.0  ;;  %v4324_v59 = vadd.f32 %v4319_v53, %v3491_v22 }
 0x553   :  { %v4321_v4 = vpop.f32.mrf.mxu1 }
 0x554   :  { %v4326_v37 = vmax.f32 %v4324_v59, 0.0  ;;  %v4339_v5 = vmul.f32 %v4332_v63, %v4325_v24 }
 0x556   :  { %v4340_v61 = vmul.f32 %v4336_v3, %v4326_v37 }
 0x558   :  { %v4341_v10 = vadd.f32 %v4340_v61, %v4339_v5 }
 0x55a   :  { %4342 = vadd.xlane.f32.xlu0 %v4341_v10 }
 0x5e3   :  { %v4343_v12 = vpop.xlane.xlu0 %4342 }
 0x5e4   :  { %v4351_v14 = vadd.f32 %v4805_v46, %v4343_v12 }
 0x5e6   :  { %4353 = vst.msk [vmem:[%s5958_s7] sm:$0xff] %vm4352_vm3, %v4351_v14 }
 0x5e7   :  { %4358 = vsyncpa [#allocation4], 1 }
 0x5e8   :  { %4359 = vsyncpa [#allocation6], 1 }
 0x5e9   :  { %4360 = vsyncpa [#allocation9], 1 }

</bundles_post_ra>
